<compile_context>
chip_gen: v5e
topology: v5e:2x2
jax: 0.10.0
libtpu: 0.0.40
codegen_flags: <defaults>
</compile_context>

<pallas_src>
import functools

import jax
import jax.numpy as jnp
from jax import lax
from jax.experimental import pallas as pl
from jax.experimental.pallas import tpu as pltpu


# -----------------------------------------------------------------------------
# Fused forward kernel
# -----------------------------------------------------------------------------
def _fused_forward_kernel(
        x_ref, pos_ref, emb_w_ref,
        wqkv_ref, bqkv_ref, wo_ref, lnv_ref,
        w1_ref, b1_ref, w2_ref,
        hw1_ref, hb1_ref, hw2_ref, hb2_ref,
        o_ref, *, nhead, num_layers):
    f32, bf16 = jnp.float32, jnp.bfloat16
    Bblk, S, data_dim = x_ref.shape
    d_model = emb_w_ref.shape[1]
    dh = d_model // nhead
    M = Bblk * S

    # --- embedding + (spatial + temporal pos + embedding bias) -------------
    x2 = x_ref[...].reshape(M, data_dim)
    h = jnp.dot(x2.astype(bf16), emb_w_ref[...], preferred_element_type=f32)
    h = (h.reshape(Bblk, S, d_model) + pos_ref[...]).reshape(M, d_model)

    def layernorm(t, g, b):
        mu = jnp.mean(t, axis=-1, keepdims=True)
        var = jnp.mean((t - mu) ** 2, axis=-1, keepdims=True)
        return (t - mu) * lax.rsqrt(var + 1e-5) * g + b

    # --- encoder layers (small compile-time constant -> unrolled) -----------
    # TODO(synk): switch to lax.fori_loop over the stacked-L axis if the layer
    # count grows enough for unrolled code size / live ranges to matter.
    for l in range(num_layers):
        lnv = lnv_ref[l]                                   # (6, D) f32
        bo, ln1g, ln1b, b2, ln2g, ln2b = (lnv[i:i + 1] for i in range(6))

        x = h
        # single lane-dense QKV projection (softmax scale folded into Wq/bq)
        qkv = (jnp.dot(x.astype(bf16), wqkv_ref[l],
                       preferred_element_type=f32) + bqkv_ref[l]).astype(bf16)

        def head(col0, b, hh):
            c = col0 + hh * dh
            return qkv[b * S:(b + 1) * S, c:c + dh]        # (S, dh) bf16

        bh = [(b, hh) for b in range(Bblk) for hh in range(nhead)]
        q3 = jnp.stack([head(0, b, hh) for b, hh in bh])            # (BH,S,dh)
        k3 = jnp.stack([head(d_model, b, hh) for b, hh in bh])
        v3 = jnp.stack([head(2 * d_model, b, hh) for b, hh in bh])

        # scaled dot-product attention, all (batch, head) pairs batched
        s = jnp.einsum('hqd,hkd->hqk', q3, k3, preferred_element_type=f32)
        s = s - jnp.max(s, axis=-1, keepdims=True)
        p = jnp.exp(s)
        denom = jnp.sum(p, axis=-1, keepdims=True)
        o3 = jnp.einsum('hqk,hkd->hqd', p.astype(bf16), v3,
                        preferred_element_type=f32)
        o3 = o3 * pl.reciprocal(denom, approx=True)        # normalize after PV

        # concat heads (lanes) / batch rows (sublanes) -> (M, D), one Wo matmul
        o_cat = jnp.concatenate(
            [jnp.concatenate([o3[b * nhead + hh] for hh in range(nhead)],
                             axis=-1)
             for b in range(Bblk)], axis=0)
        attn = jnp.dot(o_cat.astype(bf16), wo_ref[l],
                       preferred_element_type=f32) + bo

        # post-LN encoder layer (nn.TransformerEncoderLayer, relu, eval mode)
        y = layernorm(x + attn, ln1g, ln1b)
        hdn = jnp.dot(y.astype(bf16), w1_ref[l], preferred_element_type=f32)
        hdn = jnp.maximum(hdn + b1_ref[l], 0.0)
        ff = jnp.dot(hdn.astype(bf16), w2_ref[l],
                     preferred_element_type=f32) + b2
        h = layernorm(y + ff, ln2g, ln2b)

    # --- fused mean|logvar heads; lane-dense (.., 128) output ---------------
    hd = jnp.dot(h.astype(bf16), hw1_ref[...], preferred_element_type=f32)
    hd = jnp.maximum(hd + hb1_ref[...], 0.0)
    out = jnp.dot(hd.astype(bf16), hw2_ref[...],
                  preferred_element_type=f32) + hb2_ref[...]
    o_ref[...] = out.reshape(Bblk, S, out.shape[-1])


# -----------------------------------------------------------------------------
# pallas_call wrapper
# -----------------------------------------------------------------------------
_WEIGHT_ORDER = ("emb_w", "wqkv", "bqkv", "wo", "lnv", "w1", "b1", "w2",
                 "head_w1", "head_b1", "head_w2", "head_b2")


def fused_forward(tokens, pos, packed, *, nhead, num_layers, batch_block=1):
    B, S, data_dim = tokens.shape
    d_model = packed["emb_w"].shape[1]
    out_pad = packed["head_w2"].shape[1]
    assert B % batch_block == 0, (B, batch_block)
    weights = [packed[name] for name in _WEIGHT_ORDER]

    def full_spec(a):
        nd = a.ndim
        return pl.BlockSpec(a.shape, lambda b: (0,) * nd)

    in_specs = ([pl.BlockSpec((batch_block, S, data_dim), lambda b: (b, 0, 0)),
                 pl.BlockSpec((1, S, d_model), lambda b: (0, 0, 0))] +
                [full_spec(w) for w in weights])

    return pl.pallas_call(
        functools.partial(_fused_forward_kernel, nhead=nhead,
                          num_layers=num_layers),
        out_shape=jax.ShapeDtypeStruct((B, S, out_pad), jnp.float32),
        grid=(B // batch_block,),
        in_specs=in_specs,
        out_specs=pl.BlockSpec((batch_block, S, out_pad), lambda b: (b, 0, 0)),
        compiler_params=pltpu.CompilerParams(
            dimension_semantics=("parallel",)),
    )(tokens, pos, *weights)


# -----------------------------------------------------------------------------
# Parameters: init (PyTorch-like layout) + packing into kernel layout
# -----------------------------------------------------------------------------
def init_params(key, cfg):
    d_model = cfg["d_model"]
    dff = cfg["dim_feedforward"]
    data_dim = cfg["data_dim"]
    num_patches = int((cfg["input_size"] / cfg["patch_size"]) ** 2)

    keys = iter(jax.random.split(key, 64))
    nrm = lambda shape, s=0.1: (s * jax.random.normal(next(keys), shape)
                                ).astype(jnp.float32)

    params = {
        "nan_token": jax.random.normal(next(keys), (2,)).astype(jnp.float32),
        "pad_token": jax.random.normal(next(keys), (1, 2)).astype(jnp.float32),
        "emb_w": nrm((data_dim, d_model)),
        "emb_b": nrm((1, d_model)),
        # PyTorch inits these to zeros; randomized here to exercise the path.
        "spatial_pos": nrm((1, 1, num_patches, d_model)),
        "temporal_pos": nrm((1, cfg["max_seq_len"], 1, d_model)),
        "layers": [],
        "mean_w1": nrm((d_model, dff)), "mean_b1": nrm((1, dff)),
        "mean_w2": nrm((dff, data_dim)), "mean_b2": nrm((1, data_dim)),
        "logvar_w1": nrm((d_model, dff)), "logvar_b1": nrm((1, dff)),
        "logvar_w2": nrm((dff, data_dim)), "logvar_b2": nrm((1, data_dim)),
    }
    for _ in range(cfg["num_encoder_layers"]):
        params["layers"].append({
            "wqkv": nrm((d_model, 3 * d_model)), "bqkv": nrm((1, 3 * d_model)),
            "wo": nrm((d_model, d_model)), "bo": nrm((1, d_model)),
            "ln1_g": jnp.ones((1, d_model), jnp.float32),
            "ln1_b": jnp.zeros((1, d_model), jnp.float32),
            "w1": nrm((d_model, dff)), "b1": nrm((1, dff)),
            "w2": nrm((dff, d_model)), "b2": nrm((1, d_model)),
            "ln2_g": jnp.ones((1, d_model), jnp.float32),
            "ln2_b": jnp.zeros((1, d_model), jnp.float32),
        })
    return params


def pack_params(params, cfg):
    """Pack weights into the kernel operand layout:
       * layer weights stacked on a leading L axis, matmul weights in bf16,
       * 1/sqrt(dh) softmax scale folded into Wq / bq,
       * the six D-wide per-layer vectors packed into one (L, 6, D) buffer,
       * mean/logvar heads fused (lane-dense hidden + block-diagonal second
         matmul), padded to a 128-lane output for unmasked stores."""
    d_model = cfg["d_model"]
    nhead = cfg["nhead"]
    dh = d_model // nhead
    dff = cfg["dim_feedforward"]
    data_dim = cfg["data_dim"]
    scale = 1.0 / (dh ** 0.5)
    bf = lambda a: a.astype(jnp.bfloat16)

    wqkv, bqkv, wo, lnv, w1, b1, w2 = [], [], [], [], [], [], []
    for lp in params["layers"]:
        wqkv.append(jnp.concatenate(
            [lp["wqkv"][:, :d_model] * scale, lp["wqkv"][:, d_model:]], axis=1))
        bqkv.append(jnp.concatenate(
            [lp["bqkv"][:, :d_model] * scale, lp["bqkv"][:, d_model:]], axis=1))
        wo.append(lp["wo"])
        lnv.append(jnp.concatenate([lp["bo"], lp["ln1_g"], lp["ln1_b"],
                                    lp["b2"], lp["ln2_g"], lp["ln2_b"]], axis=0))
        w1.append(lp["w1"])
        b1.append(lp["b1"])
        w2.append(lp["w2"])

    out_dim = 2 * data_dim
    out_pad = max(128, ((out_dim + 127) // 128) * 128)
    zero = jnp.zeros((dff, data_dim), jnp.float32)
    hw2 = jnp.concatenate(
        [jnp.concatenate([params["mean_w2"], zero], axis=1),
         jnp.concatenate([zero, params["logvar_w2"]], axis=1)], axis=0)
    hb2 = jnp.concatenate([params["mean_b2"], params["logvar_b2"]], axis=1)
    if out_pad > out_dim:
        hw2 = jnp.pad(hw2, ((0, 0), (0, out_pad - out_dim)))
        hb2 = jnp.pad(hb2, ((0, 0), (0, out_pad - out_dim)))

    return {
        "emb_w": bf(params["emb_w"]),
        "wqkv": bf(jnp.stack(wqkv)), "bqkv": jnp.stack(bqkv),
        "wo": bf(jnp.stack(wo)), "lnv": jnp.stack(lnv),
        "w1": bf(jnp.stack(w1)), "b1": jnp.stack(b1), "w2": bf(jnp.stack(w2)),
        "head_w1": bf(jnp.concatenate([params["mean_w1"],
                                       params["logvar_w1"]], axis=1)),
        "head_b1": jnp.concatenate([params["mean_b1"],
                                    params["logvar_b1"]], axis=1),
        "head_w2": bf(hw2), "head_b2": hb2,
    }


# -----------------------------------------------------------------------------
# JAX glue (pure layout ops)
# -----------------------------------------------------------------------------
def replace_special_tokens(x, nan_token, pad_token, pad_val=-9999.0):
    nan_tok = nan_token.reshape(1, 1, -1, 1, 1)
    x = jnp.where(jnp.isnan(x), nan_tok, x)
    pad_tok = pad_token.reshape(1, 1, -1, 1, 1)
    return jnp.where(x == pad_val, pad_tok, x)


def patchify(x, ps):
    # 'b t c (h ph) (w pw) -> b t (h w) (c ph pw)'
    B, T, C, H, W = x.shape
    x = x.reshape(B, T, C, H // ps, ps, W // ps, ps)
    x = x.transpose(0, 1, 3, 5, 2, 4, 6)
    return x.reshape(B, T, (H // ps) * (W // ps), C * ps * ps)


def unpatchify(y, ps, C, H, W):
    # 'b t (h w) (c ph pw) -> b t c (h ph) (w pw)'
    B, T = y.shape[:2]
    y = y.reshape(B, T, H // ps, W // ps, C, ps, ps)
    y = y.transpose(0, 1, 4, 2, 5, 3, 6)
    return y.reshape(B, T, C, H, W)


def forward(params, x, cfg, batch_block=1):
    B, T, C, H, W = x.shape
    ps = cfg["patch_size"]
    d_model = cfg["d_model"]
    data_dim = cfg["data_dim"]
    num_patches = int((cfg["input_size"] / ps) ** 2)
    assert num_patches == (H * W) // (ps * ps)

    x = replace_special_tokens(x, params["nan_token"], params["pad_token"])
    tokens = patchify(x, ps).reshape(B, T * num_patches, data_dim)

    pos = (params["spatial_pos"]
           + params["temporal_pos"][:, cfg["max_seq_len"] - T:, :, :])
    # embedding bias folded into the positional operand (one less add / DMA)
    pos = pos.reshape(1, T * num_patches, d_model) + params["emb_b"]

    packed = pack_params(params, cfg)
    out = fused_forward(tokens, pos, packed, nhead=cfg["nhead"],
                        num_layers=cfg["num_encoder_layers"],
                        batch_block=batch_block)           # (B, S, out_pad)

    mean = out[..., :data_dim].reshape(B, T, num_patches, data_dim)
    logvar = out[..., data_dim:2 * data_dim].reshape(B, T, num_patches, data_dim)
    mean = unpatchify(mean, ps, C, H, W)
    logvar = unpatchify(logvar, ps, C, H, W)
    return mean[:, -1, ...], logvar[:, -1, ...]


# -----------------------------------------------------------------------------
# Pure-JAX reference (mirrors the PyTorch module) for a correctness check
# -----------------------------------------------------------------------------
def _layernorm_ref(t, g, b, eps=1e-5):
    mu = jnp.mean(t, axis=-1, keepdims=True)
    var = jnp.mean((t - mu) ** 2, axis=-1, keepdims=True)
    return (t - mu) / jnp.sqrt(var + eps) * g + b


def forward_reference(params, x, cfg):
    B, T, C, H, W = x.shape
    ps = cfg["patch_size"]
    d_model = cfg["d_model"]
    data_dim = cfg["data_dim"]
    nhead = cfg["nhead"]
    dh = d_model // nhead
    num_patches = int((cfg["input_size"] / ps) ** 2)

    x = replace_special_tokens(x, params["nan_token"], params["pad_token"])
    tok = patchify(x, ps)
    h = tok @ params["emb_w"] + params["emb_b"]
    h = h + params["spatial_pos"] + params["temporal_pos"][:, cfg["max_seq_len"] - T:, :, :]
    h = h.reshape(B, T * num_patches, d_model)

    for lp in params["layers"]:
        qkv = h @ lp["wqkv"] + lp["bqkv"]
        q, k, v = (qkv[..., :d_model], qkv[..., d_model:2 * d_model],
                   qkv[..., 2 * d_model:])
        split = lambda t: t.reshape(B, -1, nhead, dh).transpose(0, 2, 1, 3)
        qh, kh, vh = split(q), split(k), split(v)
        s = jnp.einsum('bhqd,bhkd->bhqk', qh, kh) / (dh ** 0.5)
        pattn = jax.nn.softmax(s, axis=-1)
        o = jnp.einsum('bhqk,bhkd->bhqd', pattn, vh)
        o = o.transpose(0, 2, 1, 3).reshape(B, -1, d_model)
        attn = o @ lp["wo"] + lp["bo"]
        y = _layernorm_ref(h + attn, lp["ln1_g"], lp["ln1_b"])
        ff = jax.nn.relu(y @ lp["w1"] + lp["b1"]) @ lp["w2"] + lp["b2"]
        h = _layernorm_ref(y + ff, lp["ln2_g"], lp["ln2_b"])

    mean = jax.nn.relu(h @ params["mean_w1"] + params["mean_b1"]) @ params["mean_w2"] + params["mean_b2"]
    logvar = jax.nn.relu(h @ params["logvar_w1"] + params["logvar_b1"]) @ params["logvar_w2"] + params["logvar_b2"]
    mean = unpatchify(mean.reshape(B, T, num_patches, data_dim), ps, C, H, W)
    logvar = unpatchify(logvar.reshape(B, T, num_patches, data_dim), ps, C, H, W)
    return mean[:, -1, ...], logvar[:, -1, ...]


# -----------------------------------------------------------------------------
# Main
# -----------------------------------------------------------------------------
if __name__ == "__main__":
    cfg = {
        "d_model": 32,
        "nhead": 4,
        "num_encoder_layers": 2,
        "dim_feedforward": 64,
        "max_seq_len": 8,
        "dropout": 0.0,          # eval semantics; dropout is identity
        "activation": "relu",
        "input_size": 16,
        "patch_size": 4,
        "data_dim": 2 * 4 * 4,   # channels * patch_size**2
    }

    key = jax.random.PRNGKey(0)
    pkey, xkey = jax.random.split(key)
    params = init_params(pkey, cfg)

    B, T, C, H, W = 2, cfg["max_seq_len"], 2, 16, 16
    x = jax.random.normal(xkey, (B, T, C, H, W), dtype=jnp.float32)
    # inject special values to exercise replace_special_tokens
    x = x.at[0, 0, 0, 0, 0].set(jnp.nan)
    x = x.at[1, 2, 1, 3, 5].set(-9999.0)

    mean_ref, logvar_ref = jax.jit(
        lambda p, xx: forward_reference(p, xx, cfg))(params, x)
    jax.block_until_ready((mean_ref, logvar_ref))

    def check(got, ref, tag):
        # tolerance covers bf16 MXU inputs + the approx EUP reciprocal in softmax
        err = float(jnp.max(jnp.abs(got - ref)))
        scl = float(jnp.max(jnp.abs(ref)))
        assert err <= 0.1 * scl + 1e-2, (tag, err, scl)

    # batch_block=1 -> 2 parallel grid steps (v7x: both TensorCores busy);
    # batch_block=B -> one fat step, batch folded into matmul M (v5e / v6e).
    for bb in (1, B):
        fwd = jax.jit(functools.partial(forward, cfg=cfg, batch_block=bb))
        mean, logvar = fwd(params, x)
        jax.block_until_ready((mean, logvar))

        assert mean.shape == (B, C, H, W) and logvar.shape == (B, C, H, W)
        assert bool(jnp.all(jnp.isfinite(mean)))
        assert bool(jnp.all(jnp.isfinite(logvar)))
        check(mean, mean_ref, f"mean bb={bb}")
        check(logvar, logvar_ref, f"logvar bb={bb}")

    print("KERNEL_OK")
</pallas_src>

<mosaic_0001>
module {
  func.func @main(%arg0: i32, %arg1: i32, %arg2: i32, %arg3: i32, %arg4: memref<1x1x128x128xf32, #tpu.memory_space<vmem>>, %arg5: memref<1x1x128x8xf32, #tpu.memory_space<vmem>>, %arg6: memref<1x1x128x8xf32, #tpu.memory_space<vmem>>, %arg7: memref<1x1x128x1xf32, #tpu.memory_space<vmem>>, %arg8: memref<1x1x128x1xf32, #tpu.memory_space<vmem>>) attributes {dimension_semantics = [#tpu.dimension_semantics<parallel>, #tpu.dimension_semantics<parallel>, #tpu.dimension_semantics<parallel>, #tpu.dimension_semantics<arbitrary>], iteration_bounds = array<i64: 2, 4, 1, 1>, scratch_operands = 2 : i64, window_params = [{transform_indices = @qk_fn, window_bounds = array<i64: 1, 1, 128, 128>}, {transform_indices = @v_fn, window_bounds = array<i64: 1, 1, 128, 8>}, {transform_indices = @oi_fn, window_bounds = array<i64: 1, 1, 128, 8>}]} {
    %c0 = arith.constant 0 : index
    %c0_i32 = arith.constant 0 : i32
    %0 = arith.cmpi eq, %c0_i32, %arg3 : i32
    scf.if %0 {
      %cst_3 = arith.constant dense<0.000000e+00> : vector<1x1x128x8xf32>
      vector.store %cst_3, %arg6[%c0, %c0, %c0, %c0] : memref<1x1x128x8xf32, #tpu.memory_space<vmem>>, vector<1x1x128x8xf32>
      %cst_4 = arith.constant dense<0xFF800000> : vector<1x1x128x1xf32>
      vector.store %cst_4, %arg7[%c0, %c0, %c0, %c0] : memref<1x1x128x1xf32, #tpu.memory_space<vmem>>, vector<1x1x128x1xf32>
      %cst_5 = arith.constant dense<0.000000e+00> : vector<1x1x128x1xf32>
      vector.store %cst_5, %arg8[%c0, %c0, %c0, %c0] : memref<1x1x128x1xf32, #tpu.memory_space<vmem>>, vector<1x1x128x1xf32>
    }
    %1 = vector.load %arg4[%c0, %c0, %c0, %c0] : memref<1x1x128x128xf32, #tpu.memory_space<vmem>>, vector<1x1x128x128xf32>
    %cst = arith.constant dense<0xFF800000> : vector<1x1x128xf32>
    %2 = vector.multi_reduction <maximumf>, %1, %cst [3] : vector<1x1x128x128xf32> to vector<1x1x128xf32>
    %3 = vector.shape_cast %2 : vector<1x1x128xf32> to vector<1x1x128x1xf32>
    %4 = vector.load %arg7[%c0, %c0, %c0, %c0] : memref<1x1x128x1xf32, #tpu.memory_space<vmem>>, vector<1x1x128x1xf32>
    %5 = arith.maximumf %4, %3 : vector<1x1x128x1xf32>
    %cst_0 = arith.constant dense<0.000000e+00> : vector<1x1x128x1xf32>
    %6 = arith.cmpf oeq, %4, %5 : vector<1x1x128x1xf32>
    %7 = arith.subf %4, %5 : vector<1x1x128x1xf32>
    %8 = arith.select %6, %cst_0, %7 : vector<1x1x128x1xi1>, vector<1x1x128x1xf32>
    %9 = vector.broadcast %5 : vector<1x1x128x1xf32> to vector<1x1x128x128xf32>
    %10 = arith.subf %1, %9 : vector<1x1x128x128xf32>
    %11 = math.exp %10 : vector<1x1x128x128xf32>
    %cst_1 = arith.constant dense<0.000000e+00> : vector<1x1x128xf32>
    %12 = vector.multi_reduction <add>, %11, %cst_1 [3] : vector<1x1x128x128xf32> to vector<1x1x128xf32>
    %13 = vector.shape_cast %12 : vector<1x1x128xf32> to vector<1x1x128x1xf32>
    %14 = vector.load %arg8[%c0, %c0, %c0, %c0] : memref<1x1x128x1xf32, #tpu.memory_space<vmem>>, vector<1x1x128x1xf32>
    %15 = math.exp %8 : vector<1x1x128x1xf32>
    %16 = arith.mulf %15, %14 : vector<1x1x128x1xf32>
    %17 = arith.addf %16, %13 : vector<1x1x128x1xf32>
    %18 = vector.load %arg6[%c0, %c0, %c0, %c0] : memref<1x1x128x8xf32, #tpu.memory_space<vmem>>, vector<1x1x128x8xf32>
    %19 = math.exp %8 : vector<1x1x128x1xf32>
    %20 = arith.mulf %19, %14 : vector<1x1x128x1xf32>
    %21 = vector.broadcast %20 : vector<1x1x128x1xf32> to vector<1x1x128x8xf32>
    %22 = arith.mulf %21, %18 : vector<1x1x128x8xf32>
    %23 = vector.load %arg5[%c0, %c0, %c0, %c0] : memref<1x1x128x8xf32, #tpu.memory_space<vmem>>, vector<1x1x128x8xf32>
    %24 = vector.shape_cast %23 : vector<1x1x128x8xf32> to vector<128x8xf32>
    %25 = vector.shape_cast %11 : vector<1x1x128x128xf32> to vector<128x128xf32>
    %26 = vector.shape_cast %22 : vector<1x1x128x8xf32> to vector<128x8xf32>
    %27 = tpu.matmul %25, %24, %26 {dimension_numbers = #tpu.dot_dimension_numbers<[1], [0], [0], [1], [0, 0, 1, 1], [], []>, precision = #tpu.contract_precision<bf16>} : vector<128x128xf32>, vector<128x8xf32>, vector<128x8xf32> -> vector<128x8xf32>
    %28 = vector.shape_cast %27 : vector<128x8xf32> to vector<1x1x128x8xf32>
    %cst_2 = arith.constant dense<1.000000e+00> : vector<1x1x128x1xf32>
    %29 = arith.divf %cst_2, %17 : vector<1x1x128x1xf32>
    %30 = vector.broadcast %29 : vector<1x1x128x1xf32> to vector<1x1x128x8xf32>
    %31 = arith.mulf %28, %30 : vector<1x1x128x8xf32>
    %32 = vector.shape_cast %31 : vector<1x1x128x8xf32> to vector<1x1x128x8xf32>
    vector.store %32, %arg6[%c0, %c0, %c0, %c0] : memref<1x1x128x8xf32, #tpu.memory_space<vmem>>, vector<1x1x128x8xf32>
    vector.store %5, %arg7[%c0, %c0, %c0, %c0] : memref<1x1x128x1xf32, #tpu.memory_space<vmem>>, vector<1x1x128x1xf32>
    vector.store %17, %arg8[%c0, %c0, %c0, %c0] : memref<1x1x128x1xf32, #tpu.memory_space<vmem>>, vector<1x1x128x1xf32>
    return
  }
  func.func @qk_fn(%arg0: i32, %arg1: i32, %arg2: i32, %arg3: i32) -> (i32, i32, i32, i32) {
    return %arg0, %arg1, %arg2, %arg3 : i32, i32, i32, i32
  }
  func.func @v_fn(%arg0: i32, %arg1: i32, %arg2: i32, %arg3: i32) -> (i32, i32, i32, i32) {
    %c0_i32 = arith.constant 0 : i32
    return %arg0, %arg1, %arg3, %c0_i32 : i32, i32, i32, i32
  }
  func.func @oi_fn(%arg0: i32, %arg1: i32, %arg2: i32, %arg3: i32) -> (i32, i32, i32, i32) {
    %c0_i32 = arith.constant 0 : i32
    return %arg0, %arg1, %arg2, %c0_i32 : i32, i32, i32, i32
  }
}

</mosaic_0001>

<bundles_post_ra>
// kernel: online-softmax
= control target key start
LH: loop header
LB: loop body
LE: loop exit
PB: predicated region body
PF: predicated region fallthrough
CT: control target
= control target key end

     0   :  { %s1692_s9 = smov 0   ;;  %s1694_s10 = smov 0   ;;  %s2573_s0 = inlined_call_operand.vmem [shape: f32[2,4,128,128], index: 0, kind: input, shape index: {}]   ;;  %s2574_s1 = inlined_call_operand.vmem [shape: f32[2,4,128,8], index: 1, kind: input, shape index: {}]   ;;  %s2575_s2 = inlined_call_operand.vmem [shape: f32[2,4,128,8], index: 2, kind: output, shape index: {}]  }
   0x1   :  { %s1696_s11 = smov 0   ;;  %s1698_s12 = smov 0  }
   0x2   :  { %s1700_s13 = smov 0  }
   0x3 LB: > { %s34_s14 = sadd.s32 1, %s1664_s11  ;;  %s38_s15 = sadd.s32 1, %s1668_s12  ;;  %s1672_s13 = sphi %s1700_s13, %s12_s13   ;;  %s1668_s12 = sphi %s1698_s12, %s2597_s12   ;;  %s1664_s11 = sphi %s1696_s11, %s2596_s11   ;;  %s1660_s10 = sphi %s1694_s10, %s2595_s10   ;;  %s1656_s9 = sphi %s1692_s9, %s2594_s9  }
   0x4   : > { %p36_p0 = scmp.ge.s32.totalorder %s34_s14, 4  ;;  %p1432_p1 = scmp.ge.s32.totalorder %s1672_s13, 1 }
   0x5   : > { %p183_p2 = scmp.lt.s32.totalorder %s1672_s13, 9 }
   0x6   : > { %s2599_s14 = smov (%p36_p0, %s34_s14), 0  ;;  %s2601_s15 = smov (!%p36_p0, %s38_s15), %s1668_s12 }
   0x7   : > { %p184_p3 = pnand %p1432_p1, %p183_p2  ;;  %p40_p4 = scmp.ge.s32.totalorder %s2601_s15, 2 }
   0x8   : > { %p238_p5 = scmp.lt.s32.totalorder (!%p184_p3), %s1660_s10, 1  ;;  %p240_p6 = scmp.lt.s32.totalorder (!%p184_p3), %s1656_s9, 3 }
   0x9   : > { %s2603_s15 = smov (%p40_p4, %s2601_s15), 0  ;;  %187 = sbr.rel (%p184_p3) target bundleno = 564 (0x234), region = 28 }
   0xe   : > { %s2605_s10 = smov (!%p238_p5, %s1660_s10), 1  ;;  %s2607_s9 = smov (!%p240_p6, %s1656_s9), 3  ;;  %vm303_vm0 = vcmask 7168   ;;  %v1674_v6 = vmov -inf   ;;  %v1675_v17 = vmov 0   ;;  %v1676_v18 = vmov 0.0  }
   0xf   : > { %s1434_s16 = sshll.u32 %s2605_s10, 6  ;;  %s1433_s17 = sshll.u32 %s2607_s9, 4  ;;  %306 = vst.msk [vmem:[#allocation2 + $0x10] sm:$0xff] %vm303_vm0, %v1674_v6  ;;  %1537 = vset.pattern.permute.xlu0 %v1675_v17  ;;  %1535 = vset.pattern.permute.xlu1 %v1675_v17 }
  0x10   : > { %s250_s18 = sadd.s32 %s1434_s16, %s1433_s17  ;;  %304 = vst.msk [vmem:[#allocation2] sm:$0xff] %vm303_vm0, %v1674_v6  ;;  %1536 = vset.pattern.permute.xlu2 %v1675_v17 }
  0x11   : > { %s1722_s19 = sshll.u32 %s250_s18, 3  ;;  %305 = vst.msk [vmem:[#allocation2 + $0x8] sm:$0xff] %vm303_vm0, %v1674_v6 }
  0x12   : > { %s1728_s22 = scalar_lea.vmem %s2573_s0, %s1722_s19  ;;  %307 = vst.msk [vmem:[#allocation2 + $0x18] sm:$0xff] %vm303_vm0, %v1674_v6  ;;  %s2022_s25 = scalar_lea.vmem %s2574_s1, %s1722_s19 }
  0x13   : > { %v1731_v0 = vld [vmem:[%s1728_s22 + $0x10] sm:$0xff]  ;;  %v1734_v1 = vld [vmem:[%s1728_s22] sm:$0xff]  ;;  %v1743_v3 = vld [vmem:[%s1728_s22 + $0x8] sm:$0xff]  ;;  %308 = vst.msk [vmem:[#allocation2 + $0x20] sm:$0xff] %vm303_vm0, %v1674_v6  ;;  %s2111_s28 = scalar_lea.vmem %s2575_s2, %s1722_s19 }
  0x14   : > { %v1737_v2 = vld [vmem:[%s1728_s22 + $0x20] sm:$0xff]  ;;  %356 = vmax.xlane.f32.xlu1 %v1731_v0  ;;  %352 = vmax.xlane.f32.xlu0 %v1734_v1  ;;  %v1746_v4 = vld [vmem:[%s1728_s22 + $0x18] sm:$0xff]  ;;  %v1749_v5 = vld [vmem:[%s1728_s22 + $0x28] sm:$0xff]  ;;  %309 = vst.msk [vmem:[#allocation2 + $0x28] sm:$0xff] %vm303_vm0, %v1674_v6 }
  0x15   : > { %360 = vmax.xlane.f32.xlu2 %v1737_v2  ;;  %v1759_v7 = vld [vmem:[%s1728_s22 + $0x30] sm:$0xff]  ;;  %v1762_v8 = vld [vmem:[%s1728_s22 + $0x38] sm:$0xff]  ;;  %v1766_v9 = vld [vmem:[%s1728_s22 + $0x40] sm:$0xff]  ;;  %310 = vst.msk [vmem:[#allocation2 + $0x30] sm:$0xff] %vm303_vm0, %v1674_v6 }
  0x16   : > { %311 = vst.msk [vmem:[#allocation2 + $0x38] sm:$0xff] %vm303_vm0, %v1674_v6  ;;  %v1779_v10 = vld [vmem:[%s1728_s22 + $0x48] sm:$0xff]  ;;  %v1782_v11 = vld [vmem:[%s1728_s22 + $0x50] sm:$0xff]  ;;  %v1786_v12 = vld [vmem:[%s1728_s22 + $0x58] sm:$0xff] }
  0x17   : > { %312 = vst.msk [vmem:[#allocation2 + $0x40] sm:$0xff] %vm303_vm0, %v1674_v6  ;;  %v1795_v13 = vld [vmem:[%s1728_s22 + $0x60] sm:$0xff]  ;;  %v1798_v14 = vld [vmem:[%s1728_s22 + $0x68] sm:$0xff]  ;;  %v1801_v15 = vld [vmem:[%s1728_s22 + $0x70] sm:$0xff] }
  0x18   : > { %313 = vst.msk [vmem:[#allocation2 + $0x48] sm:$0xff] %vm303_vm0, %v1674_v6  ;;  %v1807_v16 = vld [vmem:[%s1728_s22 + $0x78] sm:$0xff]  ;;  %v1842_v19 = vld [vmem:[#allocation2 + $0x10] sm:$0xff]  ;;  %v1844_v20 = vld [vmem:[#allocation2] sm:$0xff] }
  0x19   : > { %314 = vst.msk [vmem:[#allocation2 + $0x50] sm:$0xff] %vm303_vm0, %v1674_v6  ;;  %v1861_v28 = vld [vmem:[#allocation2 + $0x8] sm:$0xff]  ;;  %v1863_v29 = vld [vmem:[#allocation2 + $0x18] sm:$0xff] }
  0x1a   : > { %315 = vst.msk [vmem:[#allocation2 + $0x58] sm:$0xff] %vm303_vm0, %v1674_v6  ;;  %v1846_v23 = vld [vmem:[#allocation2 + $0x20] sm:$0xff] }
  0x1b   : > { %316 = vst.msk [vmem:[#allocation2 + $0x60] sm:$0xff] %vm303_vm0, %v1674_v6  ;;  %v1865_v30 = vld [vmem:[#allocation2 + $0x28] sm:$0xff] }
  0x1c   : > { %354 = vmax.xlane.f32.xlu0 %v1743_v3  ;;  %358 = vmax.xlane.f32.xlu1 %v1746_v4  ;;  %317 = vst.msk [vmem:[#allocation2 + $0x68] sm:$0xff] %vm303_vm0, %v1674_v6  ;;  %v1884_v37 = vld [vmem:[#allocation2 + $0x30] sm:$0xff] }
  0x1d   : > { %362 = vmax.xlane.f32.xlu2 %v1749_v5  ;;  %318 = vst.msk [vmem:[#allocation2 + $0x70] sm:$0xff] %vm303_vm0, %v1674_v6  ;;  %v1886_v38 = vld [vmem:[#allocation2 + $0x38] sm:$0xff] }
  0x1e   : > { %319 = vst.msk [vmem:[#allocation2 + $0x78] sm:$0xff] %vm303_vm0, %v1674_v6  ;;  %v1888_v39 = vld [vmem:[#allocation2 + $0x40] sm:$0xff] }
  0x1f   : > { %320 = vst.msk [vmem:[#allocation3] sm:$0xff] %vm303_vm0, %v1676_v18  ;;  %v1907_v46 = vld [vmem:[#allocation2 + $0x48] sm:$0xff] }
  0x20   : > { %321 = vst.msk [vmem:[#allocation3 + $0x8] sm:$0xff] %vm303_vm0, %v1676_v18  ;;  %v1909_v47 = vld [vmem:[#allocation2 + $0x50] sm:$0xff] }
  0x21   : > { %322 = vst.msk [vmem:[#allocation3 + $0x10] sm:$0xff] %vm303_vm0, %v1676_v18  ;;  %v1911_v48 = vld [vmem:[#allocation2 + $0x58] sm:$0xff] }
  0x22   : > { %323 = vst.msk [vmem:[#allocation3 + $0x18] sm:$0xff] %vm303_vm0, %v1676_v18  ;;  %v1935_v57 = vld [vmem:[#allocation2 + $0x60] sm:$0xff] }
  0x23   : > { %324 = vst.msk [vmem:[#allocation3 + $0x20] sm:$0xff] %vm303_vm0, %v1676_v18  ;;  %v1937_v58 = vld [vmem:[#allocation2 + $0x68] sm:$0xff] }
  0x24   : > { %364 = vmax.xlane.f32.xlu0 %v1759_v7  ;;  %366 = vmax.xlane.f32.xlu1 %v1762_v8  ;;  %325 = vst.msk [vmem:[#allocation3 + $0x28] sm:$0xff] %vm303_vm0, %v1676_v18  ;;  %v1941_v59 = vld [vmem:[#allocation2 + $0x70] sm:$0xff] }
  0x25   : > { %368 = vmax.xlane.f32.xlu2 %v1766_v9  ;;  %326 = vst.msk [vmem:[#allocation3 + $0x30] sm:$0xff] %vm303_vm0, %v1676_v18 }
  0x26   : > { %327 = vst.msk [vmem:[#allocation3 + $0x38] sm:$0xff] %vm303_vm0, %v1676_v18 }
  0x27   : > { %328 = vst.msk [vmem:[#allocation3 + $0x40] sm:$0xff] %vm303_vm0, %v1676_v18 }
  0x28   : > { %329 = vst.msk [vmem:[#allocation3 + $0x48] sm:$0xff] %vm303_vm0, %v1676_v18 }
  0x29   : > { %330 = vst.msk [vmem:[#allocation3 + $0x50] sm:$0xff] %vm303_vm0, %v1676_v18 }
  0x2a   : > { %331 = vst.msk [vmem:[#allocation3 + $0x58] sm:$0xff] %vm303_vm0, %v1676_v18 }
  0x2b   : > { %332 = vst.msk [vmem:[#allocation3 + $0x60] sm:$0xff] %vm303_vm0, %v1676_v18 }
  0x2c   : > { %370 = vmax.xlane.f32.xlu0 %v1779_v10  ;;  %372 = vmax.xlane.f32.xlu1 %v1782_v11  ;;  %333 = vst.msk [vmem:[#allocation3 + $0x68] sm:$0xff] %vm303_vm0, %v1676_v18 }
  0x2d   : > { %374 = vmax.xlane.f32.xlu2 %v1786_v12  ;;  %334 = vst.msk [vmem:[#allocation3 + $0x70] sm:$0xff] %vm303_vm0, %v1676_v18 }
  0x2e   : > { %335 = vst.msk [vmem:[#allocation3 + $0x78] sm:$0xff] %vm303_vm0, %v1676_v18 }
  0x34   : > { %376 = vmax.xlane.f32.xlu0 %v1795_v13  ;;  %378 = vmax.xlane.f32.xlu1 %v1798_v14 }
  0x35   : > { %380 = vmax.xlane.f32.xlu2 %v1801_v15 }
  0x3c   : > { %382 = vmax.xlane.f32.xlu0 %v1807_v16 }
  0x87   : > { %v357_v21 = vpop.xlane.xlu1 %356  ;;  %v353_v22 = vpop.xlane.xlu0 %352 }
  0x88   : > { %v402_v24 = vmax.f32 %v1842_v19, %v357_v21  ;;  %v1850_v25 = vmax.f32 %v1844_v20, %v353_v22  ;;  %v361_v26 = vpop.xlane.xlu2 %360 }
  0x89   : > { %v1854_v27 = vmax.f32 %v1846_v23, %v361_v26 }
  0x8a   : > { %1253 = vst.msk [vmem:[#allocation2 + $0x10] sm:$0xff] %vm303_vm0, %v402_v24  ;;  %476 = vperm.xlu0 %1537, %v402_v24   ;;  %466 = vperm.xlu1 %1535, %v1850_v25   ;;  %v434_v55 = vsub.f32 %v1842_v19, %v402_v24  ;;  %vm418_vm1 = vcmp.eq.f32.partialorder %v1842_v19, %v402_v24 }
  0x8b   : > { %1251 = vst.msk [vmem:[#allocation2] sm:$0xff] %vm303_vm0, %v1850_v25  ;;  %v432_v56 = vsub.f32 %v1844_v20, %v1850_v25  ;;  %vm416_vm2 = vcmp.eq.f32.partialorder %v1844_v20, %v1850_v25  ;;  %v436_v22 = vsub.f32 %v1846_v23, %v1854_v27  ;;  %vm420_vm3 = vcmp.eq.f32.partialorder %v1846_v23, %v1854_v27 }
  0x8c   : > { %1255 = vst.msk [vmem:[#allocation2 + $0x20] sm:$0xff] %vm303_vm0, %v1854_v27  ;;  %v450_v62 = vsel %vm418_vm1, 0.0, %v434_v55  ;;  %v624_v55 = vld [vmem:[#allocation3] sm:$0xff] }
  0x8d   : > { %v448_v19 = vsel %vm416_vm2, 0.0, %v432_v56  ;;  %v644_v20 = vmul.f32 1.442695, %v450_v62  ;;  %vm286_vm2 = vcmask 64512  }
  0x8e   : > { %v640_v24 = vmul.f32 1.442695, %v448_v19  ;;  %288 = vst.msk [vmem:[%s2111_s28 + $0x8] sm:$0xff] %vm286_vm2, %v1676_v18 }
  0x8f   : > { %v355_v31 = vpop.xlane.xlu0 %354  ;;  %v359_v32 = vpop.xlane.xlu1 %358  ;;  %1538 = vpow2.f32 %v644_v20  ;;  %287 = vst.msk [vmem:[%s2111_s28] sm:$0xff] %vm286_vm2, %v1676_v18 }
  0x90   : > { %v1868_v33 = vmax.f32 %v1861_v28, %v355_v31  ;;  %v1871_v34 = vmax.f32 %v1863_v29, %v359_v32  ;;  %v363_v35 = vpop.xlane.xlu2 %362  ;;  %v1971_v31 = vld [vmem:[#allocation2 + $0x78] sm:$0xff]  ;;  %v452_v32 = vsel %vm420_vm3, 0.0, %v436_v22  ;;  %1540 = vpow2.f32 %v640_v24  ;;  %v625_v22 = vld [vmem:[#allocation3 + $0x8] sm:$0xff]  ;;  %v628_v24 = vld [vmem:[#allocation3 + $0x20] sm:$0xff]  ;;  %289 = vst.msk [vmem:[%s2111_s28 + $0x10] sm:$0xff] %vm286_vm2, %v1676_v18 }
  0x91   : > { %v1874_v36 = vmax.f32 %v1865_v30, %v363_v35  ;;  %290 = vst.msk [vmem:[%s2111_s28 + $0x18] sm:$0xff] %vm286_vm2, %v1676_v18 }
  0x92   : > { %1252 = vst.msk [vmem:[#allocation2 + $0x8] sm:$0xff] %vm303_vm0, %v1868_v33  ;;  %471 = vperm.xlu2 %1536, %v1868_v33   ;;  %486 = vperm.xlu1 %1535, %v1854_v27   ;;  %v433_v25 = vsub.f32 %v1861_v28, %v1868_v33  ;;  %vm417_vm4 = vcmp.eq.f32.partialorder %v1861_v28, %v1868_v33 }
  0x93   : > { %1254 = vst.msk [vmem:[#allocation2 + $0x18] sm:$0xff] %vm303_vm0, %v1871_v34  ;;  %v435_v26 = vsub.f32 %v1863_v29, %v1871_v34  ;;  %vm419_vm5 = vcmp.eq.f32.partialorder %v1863_v29, %v1871_v34  ;;  %v437_v29 = vsub.f32 %v1865_v30, %v1874_v36  ;;  %vm421_vm6 = vcmp.eq.f32.partialorder %v1865_v30, %v1874_v36 }
  0x94   : > { %1256 = vst.msk [vmem:[#allocation2 + $0x28] sm:$0xff] %vm303_vm0, %v1874_v36  ;;  %v449_v27 = vsel %vm417_vm4, 0.0, %v433_v25 }
  0x95   : > { %v642_v28 = vmul.f32 1.442695, %v449_v27  ;;  %v453_v56 = vsel %vm421_vm6, 0.0, %v437_v29  ;;  %291 = vst.msk [vmem:[%s2111_s28 + $0x20] sm:$0xff] %vm286_vm2, %v1676_v18 }
  0x96   : > { %v650_v62 = vmul.f32 1.442695, %v453_v56  ;;  %292 = vst.msk [vmem:[%s2111_s28 + $0x28] sm:$0xff] %vm286_vm2, %v1676_v18 }
  0x97   : > { %v365_v40 = vpop.xlane.xlu0 %364  ;;  %v367_v41 = vpop.xlane.xlu1 %366  ;;  %293 = vst.msk [vmem:[%s2111_s28 + $0x30] sm:$0xff] %vm286_vm2, %v1676_v18 }
  0x98   : > { %v1891_v42 = vmax.f32 %v1884_v37, %v365_v40  ;;  %v369_v43 = vpop.xlane.xlu2 %368  ;;  %v1894_v44 = vmax.f32 %v1886_v38, %v367_v41  ;;  %v451_v40 = vsel %vm419_vm5, 0.0, %v435_v26  ;;  %v648_v41 = vmul.f32 1.442695, %v452_v32  ;;  %v627_v26 = vld [vmem:[#allocation3 + $0x18] sm:$0xff]  ;;  %294 = vst.msk [vmem:[%s2111_s28 + $0x38] sm:$0xff] %vm286_vm2, %v1676_v18 }
  0x99   : > { %v1897_v45 = vmax.f32 %v1888_v39, %v369_v43  ;;  %v646_v33 = vmul.f32 1.442695, %v451_v40  ;;  %v1539_v43 = vpop.eup %1538  ;;  %v831_v40 = vld [vmem:[%s2022_s25 + $0x78] sm:$0xff]  ;;  %295 = vst.msk [vmem:[%s2111_s28 + $0x40] sm:$0xff] %vm286_vm2, %v1676_v18 }
  0x9a   : > { %1257 = vst.msk [vmem:[#allocation2 + $0x30] sm:$0xff] %vm303_vm0, %v1891_v42  ;;  %481 = vperm.xlu2 %1536, %v1871_v34   ;;  %496 = vperm.xlu1 %1535, %v1891_v42   ;;  %v439_v34 = vsub.f32 %v1886_v38, %v1894_v44  ;;  %vm423_vm7 = vcmp.eq.f32.partialorder %v1886_v38, %v1894_v44  ;;  %1542 = vpow2.f32 %v648_v41  ;;  %v830_v41 = vld [vmem:[%s2022_s25 + $0x70] sm:$0xff] }
  0x9b   : > { %1259 = vst.msk [vmem:[#allocation2 + $0x40] sm:$0xff] %vm303_vm0, %v1897_v45  ;;  %vm422_vm8 = vcmp.eq.f32.partialorder %v1884_v37, %v1891_v42  ;;  %1544 = vpow2.f32 %v642_v28  ;;  %v440_v38 = vsub.f32 %v1888_v39, %v1897_v45  ;;  %vm424_vm9 = vcmp.eq.f32.partialorder %v1888_v39, %v1897_v45  ;;  %832 = vmatpush.msra.mxu0 %v831_v40 }
  0x9c   : > { %1258 = vst.msk [vmem:[#allocation2 + $0x38] sm:$0xff] %vm303_vm0, %v1894_v44  ;;  %1546 = vpow2.f32 %v646_v33  ;;  %v455_v30 = vsel %vm423_vm7, 0.0, %v439_v34  ;;  %1444 = vmatpush.msra.mxu1 %v831_v40  ;;  %1445 = vmatpush.msra.mxu2 %v831_v40 }
  0x9d   : > { %1548 = vpow2.f32 %v650_v62  ;;  %v456_v39 = vsel %vm424_vm9, 0.0, %v440_v38  ;;  %1446 = vmatpush.msra.mxu3 %v831_v40  ;;  %833 = vmatpush.msra.mxu0 %v830_v41  ;;  %v637_v40 = vld [vmem:[#allocation3 + $0x68] sm:$0xff]  ;;  %296 = vst.msk [vmem:[%s2111_s28 + $0x48] sm:$0xff] %vm286_vm2, %v1676_v18 }
  0x9e   : > { %1447 = vmatpush.msra.mxu1 %v830_v41  ;;  %1448 = vmatpush.msra.mxu2 %v830_v41  ;;  %297 = vst.msk [vmem:[%s2111_s28 + $0x50] sm:$0xff] %vm286_vm2, %v1676_v18 }
  0x9f   : > { %v371_v49 = vpop.xlane.xlu0 %370  ;;  %v373_v50 = vpop.xlane.xlu1 %372  ;;  %1449 = vmatpush.msra.mxu3 %v830_v41  ;;  %v825_v41 = vld [vmem:[%s2022_s25 + $0x48] sm:$0xff]  ;;  %298 = vst.msk [vmem:[%s2111_s28 + $0x58] sm:$0xff] %vm286_vm2, %v1676_v18 }
  0xa0   : > { %v1914_v51 = vmax.f32 %v1907_v46, %v371_v49  ;;  %v375_v52 = vpop.xlane.xlu2 %374  ;;  %v1917_v53 = vmax.f32 %v1909_v47, %v373_v50  ;;  %v438_v49 = vsub.f32 %v1884_v37, %v1891_v42  ;;  %v626_v50 = vld [vmem:[#allocation3 + $0x10] sm:$0xff]  ;;  %299 = vst.msk [vmem:[%s2111_s28 + $0x60] sm:$0xff] %vm286_vm2, %v1676_v18 }
  0xa1   : > { %v1920_v54 = vmax.f32 %v1911_v48, %v375_v52  ;;  %v1541_v52 = vpop.eup %1540  ;;  %300 = vst.msk [vmem:[%s2111_s28 + $0x68] sm:$0xff] %vm286_vm2, %v1676_v18 }
  0xa2   : > { %1260 = vst.msk [vmem:[#allocation2 + $0x48] sm:$0xff] %vm303_vm0, %v1914_v51  ;;  %491 = vperm.xlu2 %1536, %v1874_v36   ;;  %511 = vperm.xlu0 %1537, %v1914_v51   ;;  %v1995_v36 = vmul.f32 %v1539_v43, %v626_v50  ;;  %v1543_v37 = vpop.eup %1542  ;;  %v441_v20 = vsub.f32 %v1907_v46, %v1914_v51  ;;  %v631_v50 = vld [vmem:[#allocation3 + $0x38] sm:$0xff] }
  0xa3   : > { %506 = vperm.xlu1 %1535, %v1897_v45   ;;  %1262 = vst.msk [vmem:[#allocation2 + $0x58] sm:$0xff] %vm303_vm0, %v1920_v54  ;;  %v1545_v19 = vpop.eup %1544  ;;  %vm426_vm10 = vcmp.eq.f32.partialorder %v1909_v47, %v1917_v53  ;;  %vm425_vm11 = vcmp.eq.f32.partialorder %v1907_v46, %v1914_v51  ;;  %v656_v46 = vmul.f32 1.442695, %v456_v39  ;;  %v443_v51 = vsub.f32 %v1911_v48, %v1920_v54 }
  0xa4   : > { %1261 = vst.msk [vmem:[#allocation2 + $0x50] sm:$0xff] %vm303_vm0, %v1917_v53  ;;  %v1547_v25 = vpop.eup %1546  ;;  %v2014_v32 = vmul.f32 %v1545_v19, %v625_v22  ;;  %vm427_vm12 = vcmp.eq.f32.partialorder %v1911_v48, %v1920_v54  ;;  %v829_v19 = vld [vmem:[%s2022_s25 + $0x68] sm:$0xff] }
  0xa5   : > { %v1549_v28 = vpop.eup %1548  ;;  %v459_v56 = vsel %vm427_vm12, 0.0, %v443_v51  ;;  %v633_v22 = vld [vmem:[#allocation3 + $0x48] sm:$0xff]  ;;  %834 = vmatpush.msra.mxu0 %v829_v19  ;;  %1450 = vmatpush.msra.mxu1 %v829_v19  ;;  %301 = vst.msk [vmem:[%s2111_s28 + $0x70] sm:$0xff] %vm286_vm2, %v1676_v18 }
  0xa6   : > { %v662_v38 = vmul.f32 1.442695, %v459_v56  ;;  %1451 = vmatpush.msra.mxu2 %v829_v19  ;;  %1452 = vmatpush.msra.mxu3 %v829_v19  ;;  %v638_v56 = vld [vmem:[#allocation3 + $0x70] sm:$0xff]  ;;  %302 = vst.msk [vmem:[%s2111_s28 + $0x78] sm:$0xff] %vm286_vm2, %v1676_v18 }
  0xa7   : > { %v377_v60 = vpop.xlane.xlu0 %376  ;;  %v379_v61 = vpop.xlane.xlu1 %378 }
  0xa8   : > { %v1944_v63 = vmax.f32 %v1935_v57, %v377_v60  ;;  %v381_v6 = vpop.xlane.xlu2 %380  ;;  %v1947_v17 = vmax.f32 %v1937_v58, %v379_v61  ;;  %v454_v60 = vsel %vm422_vm8, 0.0, %v438_v49  ;;  %v1997_v61 = vmul.f32 %v1541_v52, %v624_v55  ;;  %v629_v49 = vld [vmem:[#allocation3 + $0x28] sm:$0xff]  ;;  %v630_v55 = vld [vmem:[#allocation3 + $0x30] sm:$0xff] }
  0xa9   : > { %v1950_v21 = vmax.f32 %v1941_v59, %v381_v6  ;;  %v652_v42 = vmul.f32 1.442695, %v454_v60  ;;  %v442_v6 = vsub.f32 %v1909_v47, %v1917_v53  ;;  %v457_v47 = vsel %vm425_vm11, 0.0, %v441_v20 }
  0xaa   : > { %1263 = vst.msk [vmem:[#allocation2 + $0x60] sm:$0xff] %vm303_vm0, %v1944_v63  ;;  %501 = vperm.xlu2 %1536, %v1894_v44   ;;  %526 = vperm.xlu0 %1537, %v1944_v63   ;;  %v654_v44 = vmul.f32 1.442695, %v455_v30  ;;  %v658_v29 = vmul.f32 1.442695, %v457_v47  ;;  %v445_v33 = vsub.f32 %v1937_v58, %v1947_v17  ;;  %v444_v43 = vsub.f32 %v1935_v57, %v1944_v63  ;;  %v826_v47 = vld [vmem:[%s2022_s25 + $0x50] sm:$0xff] }
  0xab   : > { %521 = vperm.xlu1 %1535, %v1920_v54   ;;  %1265 = vst.msk [vmem:[#allocation2 + $0x70] sm:$0xff] %vm303_vm0, %v1950_v21  ;;  %v458_v45 = vsel %vm426_vm10, 0.0, %v442_v6  ;;  %vm429_vm13 = vcmp.eq.f32.partialorder %v1937_v58, %v1947_v17  ;;  %vm428_vm14 = vcmp.eq.f32.partialorder %v1935_v57, %v1944_v63  ;;  %v2049_v60 = vmul.f32 %v1549_v28, %v629_v49  ;;  %v634_v6 = vld [vmem:[#allocation3 + $0x50] sm:$0xff] }
  0xac   : > { %1264 = vst.msk [vmem:[#allocation2 + $0x68] sm:$0xff] %vm303_vm0, %v1947_v17  ;;  %1550 = vpow2.f32 %v654_v44  ;;  %v660_v27 = vmul.f32 1.442695, %v458_v45  ;;  %v461_v30 = vsel %vm429_vm13, 0.0, %v445_v33  ;;  %v460_v57 = vsel %vm428_vm14, 0.0, %v444_v43  ;;  %v827_v45 = vld [vmem:[%s2022_s25 + $0x58] sm:$0xff] }
  0xad   : > { %1552 = vpow2.f32 %v652_v42  ;;  %v666_v48 = vmul.f32 1.442695, %v461_v30  ;;  %v664_v58 = vmul.f32 1.442695, %v460_v57  ;;  %vm430_vm15 = vcmp.eq.f32.partialorder %v1941_v59, %v1950_v21  ;;  %v632_v42 = vld [vmem:[#allocation3 + $0x40] sm:$0xff]  ;;  %v639_v57 = vld [vmem:[#allocation3 + $0x78] sm:$0xff] }
  0xae   : > { %1554 = vpow2.f32 %v656_v46  ;;  %v824_v33 = vld [vmem:[%s2022_s25 + $0x40] sm:$0xff] }
  0xaf   : > { %v383_v23 = vpop.xlane.xlu0 %382  ;;  %1556 = vpow2.f32 %v660_v27  ;;  %v635_v27 = vld [vmem:[#allocation3 + $0x58] sm:$0xff] }
  0xb0   : > { %v1976_v35 = vmax.f32 %v1971_v31, %v383_v23  ;;  %v2016_v23 = vmul.f32 %v1543_v37, %v628_v24  ;;  %1558 = vpow2.f32 %v658_v29  ;;  %v828_v24 = vld [vmem:[%s2022_s25 + $0x60] sm:$0xff] }
  0xb1   : > { %1560 = vpow2.f32 %v662_v38  ;;  %835 = vmatpush.msra.mxu0 %v828_v24  ;;  %1453 = vmatpush.msra.mxu1 %v828_v24  ;;  %v636_v29 = vld [vmem:[#allocation3 + $0x60] sm:$0xff]  ;;  %v821_v38 = vld [vmem:[%s2022_s25 + $0x28] sm:$0xff] }
  0xb2   : > { %1266 = vst.msk [vmem:[#allocation2 + $0x78] sm:$0xff] %vm303_vm0, %v1976_v35  ;;  %516 = vperm.xlu2 %1536, %v1917_v53   ;;  %541 = vperm.xlu0 %1537, %v1976_v35   ;;  %v2024_v53 = vmul.f32 %v1547_v25, %v627_v26  ;;  %v1551_v34 = vpop.eup %1550  ;;  %v447_v37 = vsub.f32 %v1971_v31, %v1976_v35  ;;  %1562 = vpow2.f32 %v666_v48 }
  0xb3   : > { %536 = vperm.xlu1 %1535, %v1950_v21   ;;  %v1553_v52 = vpop.eup %1552  ;;  %v2051_v62 = vmul.f32 %v1551_v34, %v631_v50  ;;  %vm431_vm1 = vcmp.eq.f32.partialorder %v1971_v31, %v1976_v35  ;;  %1564 = vpow2.f32 %v664_v58  ;;  %1454 = vmatpush.msra.mxu2 %v828_v24  ;;  %v823_v50 = vld [vmem:[%s2022_s25 + $0x38] sm:$0xff] }
  0xb4   : > { %v2053_v63 = vmul.f32 %v1553_v52, %v630_v55  ;;  %v1555_v54 = vpop.eup %1554  ;;  %v463_v31 = vsel %vm431_vm1, 0.0, %v447_v37  ;;  %1455 = vmatpush.msra.mxu3 %v828_v24  ;;  %836 = vmatpush.msra.mxu0 %v827_v45  ;;  %v822_v52 = vld [vmem:[%s2022_s25 + $0x30] sm:$0xff]  ;;  %v817_v37 = vld [vmem:[%s2022_s25 + $0x8] sm:$0xff] }
  0xb5   : > { %v1557_v44 = vpop.eup %1556  ;;  %v2071_v26 = vmul.f32 %v1555_v54, %v632_v42  ;;  %v670_v46 = vmul.f32 1.442695, %v463_v31  ;;  %1456 = vmatpush.msra.mxu1 %v827_v45  ;;  %1457 = vmatpush.msra.mxu2 %v827_v45  ;;  %v820_v54 = vld [vmem:[%s2022_s25 + $0x20] sm:$0xff] }
  0xb6   : > { %v1559_v20 = vpop.eup %1558  ;;  %v2073_v39 = vmul.f32 %v1557_v44, %v634_v6  ;;  %837 = vmatpush.msra.mxu0 %v826_v47  ;;  %1458 = vmatpush.msra.mxu3 %v827_v45  ;;  %v818_v44 = vld [vmem:[%s2022_s25 + $0x10] sm:$0xff]  ;;  %v816_v42 = vld [vmem:[%s2022_s25] sm:$0xff] }
  0xb7   : > { %v2075_v35 = vmul.f32 %v1559_v20, %v633_v22  ;;  %1459 = vmatpush.msra.mxu1 %v826_v47  ;;  %1460 = vmatpush.msra.mxu2 %v826_v47 }
  0xb8   : > { %838 = vmatpush.msra.mxu0 %v825_v41  ;;  %1461 = vmatpush.msra.mxu3 %v826_v47 }
  0xb9   : > { %1462 = vmatpush.msra.mxu1 %v825_v41  ;;  %1463 = vmatpush.msra.mxu2 %v825_v41 }
  0xba   : > { %531 = vperm.xlu2 %1536, %v1947_v17   ;;  %732 = vperm.xlu0 %1537, %v1995_v36   ;;  %v446_v17 = vsub.f32 %v1941_v59, %v1950_v21  ;;  %v1561_v21 = vpop.eup %1560 }
  0xbb   : > { %722 = vperm.xlu1 %1535, %v1997_v61   ;;  %v1563_v51 = vpop.eup %1562  ;;  %v2084_v34 = vmul.f32 %v1561_v21, %v635_v27  ;;  %839 = vmatpush.msra.mxu0 %v824_v33 }
  0xbc   : > { %v462_v25 = vsel %vm430_vm15, 0.0, %v446_v17  ;;  %v1565_v28 = vpop.eup %1564  ;;  %v2086_v43 = vmul.f32 %v1563_v51, %v637_v40  ;;  %1464 = vmatpush.msra.mxu3 %v825_v41  ;;  %1465 = vmatpush.msra.mxu1 %v824_v33  ;;  %v819_v17 = vld [vmem:[%s2022_s25 + $0x18] sm:$0xff] }
  0xbd   : > { %v668_v59 = vmul.f32 1.442695, %v462_v25  ;;  %v2088_v49 = vmul.f32 %v1565_v28, %v636_v29  ;;  %840 = vmatpush.msra.mxu0 %v823_v50  ;;  %1466 = vmatpush.msra.mxu2 %v824_v33 }
  0xbe   : > { %1467 = vmatpush.msra.mxu3 %v824_v33  ;;  %1468 = vmatpush.msra.mxu1 %v823_v50 }
  0xbf   : > { %1566 = vpow2.f32 %v668_v59  ;;  %841 = vmatpush.msra.mxu0 %v822_v52  ;;  %1469 = vmatpush.msra.mxu2 %v823_v50 }
  0xc0   : > { %1568 = vpow2.f32 %v670_v46  ;;  %1470 = vmatpush.msra.mxu3 %v823_v50  ;;  %1471 = vmatpush.msra.mxu1 %v822_v52 }
  0xc1   : > { %842 = vmatpush.msra.mxu0 %v821_v38  ;;  %1472 = vmatpush.msra.mxu2 %v822_v52 }
  0xc2   : > { %727 = vperm.xlu2 %1536, %v2014_v32   ;;  %742 = vperm.xlu0 %1537, %v2016_v23  }
  0xc3   : > { %737 = vperm.xlu1 %1535, %v2024_v53   ;;  %843 = vmatpush.msra.mxu0 %v820_v54 }
  0xc4   : > { %1473 = vmatpush.msra.mxu3 %v822_v52  ;;  %1474 = vmatpush.msra.mxu1 %v821_v38 }
  0xc5   : > { %v1567_v55 = vpop.eup %1566  ;;  %844 = vmatpush.msra.mxu0 %v819_v17  ;;  %1475 = vmatpush.msra.mxu2 %v821_v38 }
  0xc6   : > { %v1569_v30 = vpop.eup %1568  ;;  %v2096_v48 = vmul.f32 %v1567_v55, %v638_v56  ;;  %1477 = vmatpush.msra.mxu1 %v820_v54  ;;  %1476 = vmatpush.msra.mxu3 %v821_v38 }
  0xc7   : > { %v2099_v58 = vmul.f32 %v1569_v30, %v639_v57  ;;  %845 = vmatpush.msra.mxu0 %v818_v44  ;;  %1478 = vmatpush.msra.mxu2 %v820_v54 }
  0xc8   : > { %1480 = vmatpush.msra.mxu1 %v819_v17  ;;  %1479 = vmatpush.msra.mxu3 %v820_v54 }
  0xc9   : > { %846 = vmatpush.msra.mxu0 %v817_v37  ;;  %1481 = vmatpush.msra.mxu2 %v819_v17 }
  0xca   : > { %747 = vperm.xlu2 %1536, %v2049_v60   ;;  %757 = vperm.xlu0 %1537, %v2051_v62  }
  0xcb   : > { %752 = vperm.xlu1 %1535, %v2053_v63   ;;  %1483 = vmatpush.msra.mxu1 %v818_v44 }
  0xcc   : > { %847 = vmatpush.msra.mxu0 %v816_v42  ;;  %1482 = vmatpush.msra.mxu3 %v819_v17 }
  0xcd   : > { %1486 = vmatpush.msra.mxu1 %v817_v37  ;;  %1484 = vmatpush.msra.mxu2 %v818_v44 }
  0xce   : > { %1485 = vmatpush.msra.mxu3 %v818_v44 }
  0xcf   : > { %1489 = vmatpush.msra.mxu1 %v816_v42  ;;  %1487 = vmatpush.msra.mxu2 %v817_v37 }
  0xd0   : > { %1488 = vmatpush.msra.mxu3 %v817_v37 }
  0xd1   : > { %1490 = vmatpush.msra.mxu2 %v816_v42 }
  0xd2   : > { %762 = vperm.xlu2 %1536, %v2071_v26   ;;  %772 = vperm.xlu0 %1537, %v2073_v39  }
  0xd3   : > { %767 = vperm.xlu1 %1535, %v2075_v35   ;;  %1491 = vmatpush.msra.mxu3 %v816_v42 }
  0xda   : > { %777 = vperm.xlu2 %1536, %v2084_v34   ;;  %787 = vperm.xlu0 %1537, %v2086_v43  }
  0xdb   : > { %782 = vperm.xlu1 %1535, %v2088_v49  }
  0xe2   : > { %792 = vperm.xlu2 %1536, %v2096_v48  }
  0xe3   : > { %797 = vperm.xlu1 %1535, %v2099_v58  }
  0xec   : > { %v472_v6 = vpop.permute.xlu2 %471 }
  0xed   : > { %v545_v25 = vsub.f32 %v1743_v3, %v472_v6 }
  0xef   : > { %v562_v3 = vmul.f32 1.442695, %v545_v25 }
  0xf4   : > { %v482_v19 = vpop.permute.xlu2 %481 }
  0xfc   : > { %v492_v20 = vpop.permute.xlu2 %491  ;;  %v467_v22 = vpop.permute.xlu1 %466 }
  0xfd   : > { %v477_v24 = vpop.permute.xlu0 %476  ;;  %v544_v31 = vsub.f32 %v1734_v1, %v467_v22 }
  0xfe   : > { %v546_v45 = vsub.f32 %v1731_v0, %v477_v24  ;;  %v547_v0 = vsub.f32 %v1746_v4, %v482_v19  ;;  %v549_v4 = vsub.f32 %v1749_v5, %v492_v20 }
  0xff   : > { %v560_v47 = vmul.f32 1.442695, %v544_v31 }
 0x100   : > { %v564_v59 = vmul.f32 1.442695, %v546_v45  ;;  %v566_v27 = vmul.f32 1.442695, %v547_v0  ;;  %v570_v29 = vmul.f32 1.442695, %v549_v4 }
 0x101   : > { %1570 = vpow2.f32 %v560_v47 }
 0x102   : > { %1572 = vpow2.f32 %v564_v59 }
 0x103   : > { %1574 = vpow2.f32 %v562_v3 }
 0x104   : > { %v487_v1 = vpop.permute.xlu1 %486  ;;  %v502_v46 = vpop.permute.xlu2 %501 }
 0x105   : > { %v548_v21 = vsub.f32 %v1737_v2, %v487_v1  ;;  %v551_v2 = vsub.f32 %v1762_v8, %v502_v46 }
 0x107   : > { %v1571_v51 = vpop.eup %1570  ;;  %v568_v40 = vmul.f32 1.442695, %v548_v21  ;;  %v574_v56 = vmul.f32 1.442695, %v551_v2 }
 0x108   : > { %v1573_v41 = vpop.eup %1572  ;;  %848 = vmatmul.f32.vlgmr.msra.gmra.mxu0 %v1571_v51 }
 0x109   : > { %1576 = vpow2.f32 %v568_v40  ;;  %596 = vadd.xlane.f32.xlu0 %v1573_v41  ;;  %v1575_v28 = vpop.eup %1574 }
 0x10a   : > { %1578 = vpow2.f32 %v566_v27 }
 0x10b   : > { %592 = vadd.xlane.f32.xlu2 %v1571_v51  ;;  %1580 = vpow2.f32 %v570_v29 }
 0x10c   : > { %v497_v33 = vpop.permute.xlu1 %496  ;;  %v517_v55 = vpop.permute.xlu2 %516 }
 0x10d   : > { %594 = vadd.xlane.f32.xlu1 %v1575_v28  ;;  %v550_v18 = vsub.f32 %v1759_v7, %v497_v33  ;;  %v554_v8 = vsub.f32 %v1782_v11, %v517_v55 }
 0x10f   : > { %v1577_v50 = vpop.eup %1576  ;;  %v572_v52 = vmul.f32 1.442695, %v550_v18  ;;  %v580_v42 = vmul.f32 1.442695, %v554_v8 }
 0x110   : > { %851 = vmatmul.f32.gmra.mxu0 %v1575_v28  ;;  %860 = vmatmul.f32.vlgmr.msra.gmra.mxu1 %v1577_v50  ;;  %v1579_v5 = vpop.eup %1578 }
 0x111   : > { %1582 = vpow2.f32 %v572_v52  ;;  %v1581_v54 = vpop.eup %1580 }
 0x112   : > { %1584 = vpow2.f32 %v574_v56 }
 0x113   : > { %598 = vadd.xlane.f32.xlu2 %v1579_v5 }
 0x114   : > { %v512_v30 = vpop.permute.xlu0 %511  ;;  %v532_v6 = vpop.permute.xlu2 %531 }
 0x115   : > { %v507_v57 = vpop.permute.xlu1 %506  ;;  %600 = vadd.xlane.f32.xlu1 %v1577_v50  ;;  %v553_v38 = vsub.f32 %v1779_v10, %v512_v30 }
 0x116   : > { %v552_v7 = vsub.f32 %v1766_v9, %v507_v57  ;;  %v557_v9 = vsub.f32 %v1798_v14, %v532_v6 }
 0x117   : > { %v578_v17 = vmul.f32 1.442695, %v553_v38  ;;  %v1583_v44 = vpop.eup %1582 }
 0x118   : > { %v576_v37 = vmul.f32 1.442695, %v552_v7  ;;  %863 = vmatmul.f32.gmra.mxu1 %v1581_v54  ;;  %604 = vadd.xlane.f32.xlu0 %v1583_v44  ;;  %v1585_v19 = vpop.eup %1584  ;;  %v586_v47 = vmul.f32 1.442695, %v557_v9 }
 0x119   : > { %854 = vmatmul.f32.gmra.mxu0 %v1573_v41 }
 0x11a   : > { %1586 = vpow2.f32 %v576_v37 }
 0x11b   : > { %1588 = vpow2.f32 %v578_v17  ;;  %602 = vadd.xlane.f32.xlu2 %v1581_v54 }
 0x11c   : > { %v527_v20 = vpop.permute.xlu0 %526  ;;  %1590 = vpow2.f32 %v580_v42  ;;  %v2181_v41 = vpop.permute.xlu2 %727 }
 0x11d   : > { %v522_v10 = vpop.permute.xlu1 %521  ;;  %606 = vadd.xlane.f32.xlu1 %v1585_v19  ;;  %v556_v11 = vsub.f32 %v1795_v13, %v527_v20 }
 0x11e   : > { %v555_v22 = vsub.f32 %v1786_v12, %v522_v10 }
 0x11f   : > { %v584_v24 = vmul.f32 1.442695, %v556_v11 }
 0x120   : > { %v1587_v25 = vpop.eup %1586  ;;  %v582_v31 = vmul.f32 1.442695, %v555_v22  ;;  %866 = vmatmul.f32.gmra.mxu1 %v1583_v44 }
 0x121   : > { %v1589_v45 = vpop.eup %1588  ;;  %1592 = vpow2.f32 %v584_v24  ;;  %872 = vmatmul.f32.vlgmr.msra.gmra.mxu2 %v1587_v25  ;;  %857 = vmatmul.f32.gmra.mxu0 %v1579_v5 }
 0x122   : > { %610 = vadd.xlane.f32.xlu0 %v1589_v45  ;;  %v1591_v59 = vpop.eup %1590  ;;  %1594 = vpow2.f32 %v582_v31 }
 0x123   : > { %608 = vadd.xlane.f32.xlu2 %v1587_v25  ;;  %1596 = vpow2.f32 %v586_v47 }
 0x124   : > { %v542_v3 = vpop.permute.xlu0 %541  ;;  %v2187_v29 = vpop.permute.xlu2 %747 }
 0x125   : > { %v537_v13 = vpop.permute.xlu1 %536  ;;  %612 = vadd.xlane.f32.xlu1 %v1591_v59  ;;  %v559_v14 = vsub.f32 %v1807_v16, %v542_v3 }
 0x126   : > { %v558_v12 = vsub.f32 %v1801_v15, %v537_v13 }
 0x127   : > { %v1593_v0 = vpop.eup %1592  ;;  %v590_v1 = vmul.f32 1.442695, %v559_v14 }
 0x128   : > { %v588_v21 = vmul.f32 1.442695, %v558_v12  ;;  %884 = vmatmul.f32.vlgmr.msra.gmra.mxu3 %v1593_v0  ;;  %869 = vmatmul.f32.gmra.mxu1 %v1585_v19  ;;  %v1595_v46 = vpop.eup %1594 }
 0x129   : > { %1598 = vpow2.f32 %v590_v1  ;;  %875 = vmatmul.f32.gmra.mxu2 %v1589_v45  ;;  %v1597_v51 = vpop.eup %1596 }
 0x12a   : > { %616 = vadd.xlane.f32.xlu0 %v1593_v0  ;;  %1600 = vpow2.f32 %v588_v21 }
 0x12b   : > { %614 = vadd.xlane.f32.xlu2 %v1595_v46 }
 0x12c   : > { %v2179_v40 = vpop.permute.xlu0 %732  ;;  %v2193_v18 = vpop.permute.xlu2 %762 }
 0x12d   : > { %618 = vadd.xlane.f32.xlu1 %v1597_v51  ;;  %v2177_v15 = vpop.permute.xlu1 %722 }
 0x12f   : > { %v1599_v27 = vpop.eup %1598 }
 0x130   : > { %887 = vmatmul.f32.gmra.mxu3 %v1597_v51  ;;  %v1601_v16 = vpop.eup %1600 }
 0x131   : > { %878 = vmatmul.f32.gmra.mxu2 %v1591_v59 }
 0x132   : > { %622 = vadd.xlane.f32.xlu0 %v1599_v27 }
 0x133   : > { %620 = vadd.xlane.f32.xlu2 %v1601_v16 }
 0x134   : > { %v2185_v28 = vpop.permute.xlu0 %742  ;;  %v2199_v55 = vpop.permute.xlu2 %777 }
 0x135   : > { %v2183_v4 = vpop.permute.xlu1 %737 }
 0x138   : > { %890 = vmatmul.f32.gmra.mxu3 %v1601_v16 }
 0x139   : > { %881 = vmatmul.f32.gmra.mxu2 %v1595_v46 }
 0x13c   : > { %v2191_v2 = vpop.permute.xlu0 %757  ;;  %v2205_v30 = vpop.permute.xlu2 %792 }
 0x13d   : > { %v2189_v33 = vpop.permute.xlu1 %752 }
 0x140   : > { %893 = vmatmul.f32.gmra.mxu3 %v1599_v27 }
 0x144   : > { %v2197_v52 = vpop.permute.xlu0 %772 }
 0x145   : > { %v2195_v50 = vpop.permute.xlu1 %767 }
 0x14c   : > { %v2203_v56 = vpop.permute.xlu0 %787 }
 0x14d   : > { %v2201_v5 = vpop.permute.xlu1 %782 }
 0x155   : > { %v2207_v57 = vpop.permute.xlu1 %797 }
 0x17c   : > { %v597_v38 = vpop.xlane.xlu0 %596 }
 0x17d   : > { %v690_v8 = vadd.f32 %v1995_v36, %v597_v38 }
 0x17e   : > { %v593_v7 = vpop.xlane.xlu2 %592 }
 0x17f   : > { %v688_v54 = vadd.f32 %v1997_v61, %v593_v7  ;;  %1602 = vrcp.f32 %v690_v8  ;;  %1269 = vst.msk [vmem:[#allocation3 + $0x10] sm:$0xff] %vm303_vm0, %v690_v8  ;;  %v936_v37 = vand.u32 2147483647, %v690_v8  ;;  %v938_v6 = vand.u32 2147483648, %v690_v8 }
 0x180   : > { %v595_v17 = vpop.xlane.xlu1 %594  ;;  %vm932_vm3 = vweird.f32 %v690_v8 }
 0x181   : > { %1604 = vrcp.f32 %v688_v54  ;;  %1267 = vst.msk [vmem:[#allocation3] sm:$0xff] %vm303_vm0, %v688_v54  ;;  %v2214_v44 = vadd.f32 %v2014_v32, %v595_v17  ;;  %vm2222_vm4 = vcmp.eq.f32.partialorder %v936_v37, 8.507059e+37  ;;  %vm902_vm5 = vweird.f32 %v688_v54 }
 0x182   : > { %v906_v9 = vand.u32 2147483647, %v688_v54  ;;  %v908_v25 = vand.u32 2147483648, %v688_v54  ;;  %v939_v31 = vor.u32 1.1754944e-38, %v938_v6 }
 0x183   : > { %1606 = vrcp.f32 %v2214_v44  ;;  %1268 = vst.msk [vmem:[#allocation3 + $0x8] sm:$0xff] %vm303_vm0, %v2214_v44  ;;  %v921_v59 = vand.u32 2147483647, %v2214_v44  ;;  %v923_v13 = vand.u32 2147483648, %v2214_v44  ;;  %vm917_vm9 = vweird.f32 %v2214_v44 }
 0x184   : > { %vm2238_vm8 = vcmp.eq.f32.partialorder %v906_v9, 8.507059e+37  ;;  %v909_v46 = vor.u32 1.1754944e-38, %v908_v25 }
 0x185   : > { %v1603_v36 = vpop.eup %1602  ;;  %vm2251_vm12 = vcmp.eq.f32.partialorder %v921_v59, 8.507059e+37  ;;  %v924_v17 = vor.u32 1.1754944e-38, %v923_v13 }
 0x186   : > { %v599_v42 = vpop.xlane.xlu2 %598  ;;  %v928_v20 = vmul.f32 %v1603_v36, %v690_v8  ;;  %vm933_vm6 = vweird.f32 %v1603_v36 }
 0x187   : > { %v1605_v61 = vpop.eup %1604  ;;  %v2220_v19 = vadd.f32 %v2024_v53, %v599_v42  ;;  %vm2247_vm10 = vmor %vm932_vm3, %vm933_vm6 }
 0x188   : > { %v601_v10 = vpop.xlane.xlu1 %600  ;;  %v898_v32 = vmul.f32 %v1605_v61, %v688_v54  ;;  %v929_v53 = vsub.f32 1.0, %v928_v20  ;;  %vm903_vm7 = vweird.f32 %v1605_v61 }
 0x189   : > { %v1607_v22 = vpop.eup %1606  ;;  %1608 = vrcp.f32 %v2220_v19  ;;  %1270 = vst.msk [vmem:[#allocation3 + $0x18] sm:$0xff] %vm303_vm0, %v2220_v19  ;;  %v2230_v24 = vadd.f32 %v2016_v23, %v601_v10  ;;  %vm904_vm13 = vmor %vm902_vm5, %vm903_vm7  ;;  %v951_v37 = vand.u32 2147483647, %v2220_v19  ;;  %vm947_vm15 = vweird.f32 %v2220_v19 }
 0x18a   : > { %v899_v45 = vsub.f32 1.0, %v898_v32  ;;  %v913_v47 = vmul.f32 %v1607_v22, %v2214_v44  ;;  %v930_v3 = vmul.f32 %v1603_v36, %v929_v53  ;;  %vm918_vm11 = vweird.f32 %v1607_v22 }
 0x18b   : > { %1610 = vrcp.f32 %v2230_v24  ;;  %1271 = vst.msk [vmem:[#allocation3 + $0x20] sm:$0xff] %vm303_vm0, %v2230_v24  ;;  %v605_v14 = vpop.xlane.xlu0 %604  ;;  %vm919_vm14 = vmor %vm917_vm9, %vm918_vm11  ;;  %v966_v11 = vand.u32 2147483647, %v2230_v24  ;;  %vm2297_vm3 = vcmp.eq.f32.partialorder %v951_v37, 8.507059e+37 }
 0x18c   : > { %v900_v23 = vmul.f32 %v1605_v61, %v899_v45  ;;  %v914_v0 = vsub.f32 1.0, %v913_v47  ;;  %v2243_v1 = vadd.f32 %v2053_v63, %v605_v14  ;;  %v931_v21 = vadd.f32 %v1603_v36, %v930_v3 }
 0x18d   : > { %vm2306_vm6 = vcmp.eq.f32.partialorder %v966_v11, 8.507059e+37 }
 0x18e   : > { %v901_v27 = vadd.f32 %v1605_v61, %v900_v23  ;;  %v915_v16 = vmul.f32 %v1607_v22, %v914_v0  ;;  %1612 = vrcp.f32 %v2243_v1  ;;  %1273 = vst.msk [vmem:[#allocation3 + $0x30] sm:$0xff] %vm303_vm0, %v2243_v1  ;;  %v603_v63 = vpop.xlane.xlu2 %602  ;;  %v935_v8 = vsel %vm2247_vm10, %v1603_v36, %v931_v21 }
 0x18f   : > { %v2255_v7 = vpop.eup %1608  ;;  %v2266_v42 = vadd.f32 %v2049_v60, %v603_v63  ;;  %v940_v20 = vsel %vm2222_vm4, %v939_v31, %v935_v8  ;;  %v953_v36 = vand.u32 2147483648, %v2220_v19  ;;  %v968_v31 = vand.u32 2147483648, %v2230_v24 }
 0x190   : > { %v607_v6 = vpop.xlane.xlu1 %606  ;;  %v905_v10 = vsel %vm904_vm13, %v1605_v61, %v901_v27  ;;  %v916_v32 = vadd.f32 %v1607_v22, %v915_v16  ;;  %1149 = vperm.xlu1 %1535, %v940_v20   ;;  %v943_v60 = vmul.f32 %v2255_v7, %v2220_v19  ;;  %vm948_vm1 = vweird.f32 %v2255_v7 }
 0x191   : > { %v1611_v9 = vpop.eup %1610  ;;  %v2271_v53 = vadd.f32 %v2051_v62, %v607_v6  ;;  %v910_v54 = vsel %vm2238_vm8, %v909_v46, %v905_v10  ;;  %1614 = vrcp.f32 %v2266_v42  ;;  %1272 = vst.msk [vmem:[#allocation3 + $0x28] sm:$0xff] %vm303_vm0, %v2266_v42  ;;  %vm962_vm4 = vweird.f32 %v2230_v24  ;;  %vm949_vm7 = vmor %vm947_vm15, %vm948_vm1 }
 0x192   : > { %1139 = vperm.xlu0 %1537, %v910_v54   ;;  %v920_v62 = vsel %vm919_vm14, %v1607_v22, %v916_v32  ;;  %v958_v61 = vmul.f32 %v1611_v9, %v2230_v24  ;;  %v944_v25 = vsub.f32 1.0, %v943_v60  ;;  %v954_v14 = vor.u32 1.1754944e-38, %v953_v36 }
 0x193   : > { %1616 = vrcp.f32 %v2271_v53  ;;  %1274 = vst.msk [vmem:[#allocation3 + $0x38] sm:$0xff] %vm303_vm0, %v2271_v53  ;;  %v925_v44 = vsel %vm2251_vm12, %v924_v17, %v920_v62  ;;  %vm963_vm5 = vweird.f32 %v1611_v9  ;;  %v969_v46 = vor.u32 1.1754944e-38, %v968_v31 }
 0x194   : > { %1144 = vperm.xlu2 %1536, %v925_v44   ;;  %v959_v45 = vsub.f32 1.0, %v958_v61  ;;  %v2293_v22 = vpop.eup %1612  ;;  %v945_v59 = vmul.f32 %v2255_v7, %v944_v25  ;;  %vm977_vm8 = vweird.f32 %v2266_v42  ;;  %v981_v63 = vand.u32 2147483647, %v2266_v42  ;;  %vm964_vm9 = vmor %vm962_vm4, %vm963_vm5 }
 0x195   : > { %v611_v47 = vpop.xlane.xlu0 %610  ;;  %v988_v51 = vmul.f32 %v2293_v22, %v2243_v1  ;;  %v983_v19 = vand.u32 2147483648, %v2266_v42  ;;  %v996_v10 = vand.u32 2147483647, %v2243_v1  ;;  %vm993_vm10 = vweird.f32 %v2293_v22 }
 0x196   : > { %v2303_v13 = vadd.f32 %v2075_v35, %v611_v47  ;;  %v960_v23 = vmul.f32 %v1611_v9, %v959_v45  ;;  %v609_v12 = vpop.xlane.xlu2 %608  ;;  %v946_v0 = vadd.f32 %v2255_v7, %v945_v59  ;;  %vm2350_vm12 = vcmp.eq.f32.partialorder %v981_v63, 8.507059e+37 }
 0x197   : > { %v1615_v27 = vpop.eup %1614  ;;  %v2315_v35 = vadd.f32 %v2071_v26, %v609_v12  ;;  %v989_v20 = vsub.f32 1.0, %v988_v51  ;;  %vm992_vm13 = vweird.f32 %v2243_v1  ;;  %v984_v45 = vor.u32 1.1754944e-38, %v983_v19 }
 0x198   : > { %1276 = vst.msk [vmem:[#allocation3 + $0x48] sm:$0xff] %vm303_vm0, %v2303_v13  ;;  %v613_v16 = vpop.xlane.xlu1 %612  ;;  %v961_v38 = vadd.f32 %v1611_v9, %v960_v23  ;;  %v950_v37 = vsel %vm949_vm7, %v2255_v7, %v946_v0  ;;  %v973_v26 = vmul.f32 %v1615_v27, %v2266_v42  ;;  %vm978_vm11 = vweird.f32 %v1615_v27  ;;  %vm2362_vm14 = vmor %vm992_vm13, %vm993_vm10 }
 0x199   : > { %v2323_v8 = vpop.eup %1616  ;;  %v2326_v17 = vadd.f32 %v2073_v39, %v613_v16  ;;  %1618 = vrcp.f32 %v2315_v35  ;;  %1275 = vst.msk [vmem:[#allocation3 + $0x40] sm:$0xff] %vm303_vm0, %v2315_v35  ;;  %v955_v6 = vsel %vm2297_vm3, %v954_v14, %v950_v37  ;;  %v990_v32 = vmul.f32 %v2293_v22, %v989_v20  ;;  %vm979_vm1 = vmor %vm977_vm8, %vm978_vm11 }
 0x19a   : > { %v965_v39 = vsel %vm964_vm9, %v1611_v9, %v961_v38  ;;  %1620 = vrcp.f32 %v2303_v13  ;;  %1154 = vperm.xlu0 %1537, %v955_v6   ;;  %v974_v7 = vsub.f32 1.0, %v973_v26  ;;  %v998_v9 = vand.u32 2147483648, %v2243_v1 }
 0x19b   : > { %1277 = vst.msk [vmem:[#allocation3 + $0x50] sm:$0xff] %vm303_vm0, %v2326_v17  ;;  %v970_v24 = vsel %vm2306_vm6, %v969_v46, %v965_v39  ;;  %v1003_v54 = vmul.f32 %v2323_v8, %v2271_v53  ;;  %1622 = vrcp.f32 %v2326_v17  ;;  %v991_v11 = vadd.f32 %v2293_v22, %v990_v32 }
 0x19c   : > { %1159 = vperm.xlu2 %1536, %v970_v24   ;;  %v975_v36 = vmul.f32 %v1615_v27, %v974_v7  ;;  %vm2366_vm15 = vcmp.eq.f32.partialorder %v996_v10, 8.507059e+37  ;;  %v1011_v1 = vand.u32 2147483647, %v2271_v53  ;;  %v999_v12 = vor.u32 1.1754944e-38, %v998_v9 }
 0x19d   : > { %v617_v60 = vpop.xlane.xlu0 %616  ;;  %v1004_v44 = vsub.f32 1.0, %v1003_v54  ;;  %v995_v23 = vsel %vm2362_vm14, %v2293_v22, %v991_v11  ;;  %v1013_v0 = vand.u32 2147483648, %v2271_v53  ;;  %vm1008_vm3 = vweird.f32 %v2323_v8 }
 0x19e   : > { %v2357_v61 = vadd.f32 %v2088_v49, %v617_v60  ;;  %v615_v25 = vpop.xlane.xlu2 %614  ;;  %v976_v31 = vadd.f32 %v1615_v27, %v975_v36  ;;  %v1000_v22 = vsel %vm2366_vm15, %v999_v12, %v995_v23  ;;  %vm1007_vm4 = vweird.f32 %v2271_v53 }
 0x19f   : > { %v2371_v49 = vpop.eup %1618  ;;  %v2376_v3 = vadd.f32 %v2084_v34, %v615_v25  ;;  %v1005_v34 = vmul.f32 %v2323_v8, %v1004_v44  ;;  %vm1012_vm5 = vcmp.eq.f32.partialorder %v1011_v1, 8.507059e+37  ;;  %vm1022_vm6 = vweird.f32 %v2315_v35  ;;  %vm1009_vm7 = vmor %vm1007_vm4, %vm1008_vm3 }
 0x1a0   : > { %1279 = vst.msk [vmem:[#allocation3 + $0x60] sm:$0xff] %vm303_vm0, %v2357_v61  ;;  %v619_v14 = vpop.xlane.xlu1 %618  ;;  %v2385_v21 = vpop.eup %1620  ;;  %v980_v51 = vsel %vm979_vm1, %v1615_v27, %v976_v31  ;;  %v1014_v53 = vor.u32 1.1754944e-38, %v1013_v0  ;;  %vm1023_vm8 = vweird.f32 %v2371_v49  ;;  %v1026_v19 = vand.u32 2147483647, %v2315_v35 }
 0x1a1   : > { %v2388_v46 = vadd.f32 %v2086_v43, %v619_v14  ;;  %1278 = vst.msk [vmem:[#allocation3 + $0x58] sm:$0xff] %vm303_vm0, %v2376_v3  ;;  %v985_v42 = vsel %vm2350_vm12, %v984_v45, %v980_v51  ;;  %v1018_v43 = vmul.f32 %v2371_v49, %v2315_v35  ;;  %1624 = vrcp.f32 %v2376_v3  ;;  %v2406_v16 = vpop.eup %1622  ;;  %vm1024_vm10 = vmor %vm1022_vm6, %vm1023_vm8 }
 0x1a2   : > { %1164 = vperm.xlu1 %1535, %v985_v42   ;;  %1169 = vperm.xlu0 %1537, %v1000_v22   ;;  %v1006_v27 = vadd.f32 %v2323_v8, %v1005_v34  ;;  %1626 = vrcp.f32 %v2357_v61  ;;  %v1033_v63 = vmul.f32 %v2385_v21, %v2303_v13  ;;  %v1028_v6 = vand.u32 2147483648, %v2315_v35 }
 0x1a3   : > { %1280 = vst.msk [vmem:[#allocation3 + $0x68] sm:$0xff] %vm303_vm0, %v2388_v46  ;;  %v1019_v38 = vsub.f32 1.0, %v1018_v43  ;;  %1628 = vrcp.f32 %v2388_v46  ;;  %vm1038_vm9 = vweird.f32 %v2385_v21  ;;  %v1048_v32 = vmul.f32 %v2406_v16, %v2326_v17 }
 0x1a4   : > { %v1010_v37 = vsel %vm1009_vm7, %v2323_v8, %v1006_v27  ;;  %v1034_v7 = vsub.f32 1.0, %v1033_v63  ;;  %v1043_v8 = vand.u32 2147483648, %v2303_v13  ;;  %v1041_v60 = vand.u32 2147483647, %v2303_v13 }
 0x1a5   : > { %v623_v26 = vpop.xlane.xlu0 %622  ;;  %v1015_v39 = vsel %vm1012_vm5, %v1014_v53, %v1010_v37  ;;  %v1020_v24 = vmul.f32 %v2371_v49, %v1019_v38  ;;  %vm1027_vm11 = vcmp.eq.f32.partialorder %v1026_v19, 8.507059e+37  ;;  %v1029_v62 = vor.u32 1.1754944e-38, %v1028_v6 }
 0x1a6   : > { %v2418_v20 = vadd.f32 %v2099_v58, %v623_v26  ;;  %1174 = vperm.xlu2 %1536, %v1015_v39   ;;  %v621_v10 = vpop.xlane.xlu2 %620  ;;  %v1035_v54 = vmul.f32 %v2385_v21, %v1034_v7  ;;  %vm1037_vm12 = vweird.f32 %v2303_v13  ;;  %v1049_v11 = vsub.f32 1.0, %v1048_v32 }
 0x1a7   : > { %v2429_v58 = vadd.f32 %v2096_v48, %v621_v10  ;;  %v1021_v9 = vadd.f32 %v2371_v49, %v1020_v24  ;;  %v1625_v36 = vpop.eup %1624  ;;  %v1044_v31 = vor.u32 1.1754944e-38, %v1043_v8  ;;  %vm1053_vm13 = vweird.f32 %v2406_v16  ;;  %vm1039_vm14 = vmor %vm1037_vm12, %vm1038_vm9 }
 0x1a8   : > { %1282 = vst.msk [vmem:[#allocation3 + $0x78] sm:$0xff] %vm303_vm0, %v2418_v20  ;;  %v2439_v44 = vpop.eup %1626  ;;  %v1036_v25 = vadd.f32 %v2385_v21, %v1035_v54  ;;  %v1050_v35 = vmul.f32 %v2406_v16, %v1049_v11  ;;  %v1056_v13 = vand.u32 2147483647, %v2326_v17  ;;  %v1058_v47 = vand.u32 2147483648, %v2326_v17 }
 0x1a9   : > { %1281 = vst.msk [vmem:[#allocation3 + $0x70] sm:$0xff] %vm303_vm0, %v2429_v58  ;;  %v1025_v48 = vsel %vm1024_vm10, %v2371_v49, %v1021_v9  ;;  %vm1042_vm0 = vcmp.eq.f32.partialorder %v1041_v60, 8.507059e+37  ;;  %v1063_v1 = vmul.f32 %v1625_v36, %v2376_v3  ;;  %v2453_v49 = vpop.eup %1628  ;;  %1630 = vrcp.f32 %v2429_v58 }
 0x1aa   : > { %v1030_v45 = vsel %vm1027_vm11, %v1029_v62, %v1025_v48  ;;  %v1040_v59 = vsel %vm1039_vm14, %v2385_v21, %v1036_v25  ;;  %v1051_v23 = vadd.f32 %v2406_v16, %v1050_v35  ;;  %vm1052_vm15 = vweird.f32 %v2326_v17 }
 0x1ab   : > { %1179 = vperm.xlu1 %1535, %v1030_v45   ;;  %v1045_v14 = vsel %vm1042_vm0, %v1044_v31, %v1040_v59  ;;  %1632 = vrcp.f32 %v2418_v20  ;;  %vm1054_vm1 = vmor %vm1052_vm15, %vm1053_vm13  ;;  %v1059_v12 = vor.u32 1.1754944e-38, %v1058_v47  ;;  %v1064_v0 = vsub.f32 1.0, %v1063_v1 }
 0x1ac   : > { %1184 = vperm.xlu0 %1537, %v1045_v14   ;;  %v1055_v21 = vsel %vm1054_vm1, %v2406_v16, %v1051_v23  ;;  %vm1057_vm3 = vcmp.eq.f32.partialorder %v1056_v13, 8.507059e+37  ;;  %v1073_v51 = vand.u32 2147483648, %v2376_v3  ;;  %v1078_v34 = vmul.f32 %v2439_v44, %v2357_v61 }
 0x1ad   : > { %v1060_v42 = vsel %vm1057_vm3, %v1059_v12, %v1055_v21  ;;  %v1065_v22 = vmul.f32 %v1625_v36, %v1064_v0  ;;  %vm1068_vm4 = vweird.f32 %v1625_v36  ;;  %v1071_v17 = vand.u32 2147483647, %v2376_v3  ;;  %v861_v21 = vpop.f32.mrf.mxu1 }
 0x1ae   : > { %1189 = vperm.xlu2 %1536, %v1060_v42   ;;  %v1079_v43 = vsub.f32 1.0, %v1078_v34  ;;  %vm1067_vm5 = vweird.f32 %v2376_v3  ;;  %v1088_v53 = vand.u32 2147483648, %v2357_v61  ;;  %v1093_v16 = vmul.f32 %v2453_v49, %v2388_v46  ;;  %v705_v34 = vld [vmem:[%s2111_s28 + $0x8] sm:$0xff] }
 0x1af   : > { %v1066_v27 = vadd.f32 %v1625_v36, %v1065_v22  ;;  %v1631_v38 = vpop.eup %1630  ;;  %vm1069_vm6 = vmor %vm1067_vm5, %vm1068_vm4  ;;  %v1074_v63 = vor.u32 1.1754944e-38, %v1073_v51  ;;  %vm1083_vm7 = vweird.f32 %v2439_v44  ;;  %v1086_v26 = vand.u32 2147483647, %v2357_v61  ;;  %v849_v51 = vpop.f32.mrf.mxu0 }
 0x1b0   : > { %v1080_v37 = vmul.f32 %v2439_v44, %v1079_v43  ;;  %vm1072_vm8 = vcmp.eq.f32.partialorder %v1071_v17, 8.507059e+37  ;;  %vm1082_vm9 = vweird.f32 %v2357_v61  ;;  %v1094_v3 = vsub.f32 1.0, %v1093_v16 }
 0x1b1   : > { %v1633_v19 = vpop.eup %1632  ;;  %v1070_v6 = vsel %vm1069_vm6, %v1625_v36, %v1066_v27  ;;  %v1101_v7 = vand.u32 2147483647, %v2388_v46  ;;  %v1103_v10 = vand.u32 2147483648, %v2388_v46  ;;  %vm1084_vm10 = vmor %vm1082_vm9, %vm1083_vm7  ;;  %v1089_v8 = vor.u32 1.1754944e-38, %v1088_v53  ;;  %v708_v53 = vld [vmem:[%s2111_s28 + $0x20] sm:$0xff] }
 0x1b2   : > { %v1075_v39 = vsel %vm1072_vm8, %v1074_v63, %v1070_v6  ;;  %v1081_v24 = vadd.f32 %v2439_v44, %v1080_v37  ;;  %v1095_v32 = vmul.f32 %v2453_v49, %v1094_v3  ;;  %vm1098_vm11 = vweird.f32 %v2453_v49  ;;  %v2497_v63 = vpop.f32.mrf.mxu2  ;;  %v711_v6 = vld [vmem:[%s2111_s28 + $0x38] sm:$0xff] }
 0x1b3   : > { %1194 = vperm.xlu1 %1535, %v1075_v39   ;;  %v1108_v9 = vmul.f32 %v1631_v38, %v2429_v58  ;;  %vm1087_vm12 = vcmp.eq.f32.partialorder %v1086_v26, 8.507059e+37  ;;  %vm1097_vm13 = vweird.f32 %v2388_v46  ;;  %v1123_v62 = vmul.f32 %v1633_v19, %v2418_v20 }
 0x1b4   : > { %v1085_v54 = vsel %vm1084_vm10, %v2439_v44, %v1081_v24  ;;  %v1096_v60 = vadd.f32 %v2453_v49, %v1095_v32  ;;  %vm1099_vm14 = vmor %vm1097_vm13, %vm1098_vm11  ;;  %vm1102_vm0 = vcmp.eq.f32.partialorder %v1101_v7, 8.507059e+37  ;;  %v1104_v11 = vor.u32 1.1754944e-38, %v1103_v10  ;;  %v704_v24 = vld [vmem:[%s2111_s28] sm:$0xff] }
 0x1b5   : > { %v1090_v61 = vsel %vm1087_vm12, %v1089_v8, %v1085_v54  ;;  %v1109_v36 = vsub.f32 1.0, %v1108_v9  ;;  %vm1113_vm15 = vweird.f32 %v1631_v38  ;;  %v1118_v48 = vand.u32 2147483648, %v2429_v58  ;;  %v864_v42 = vpop.f32.mrf.mxu1 }
 0x1b6   : > { %1199 = vperm.xlu0 %1537, %v1090_v61   ;;  %v1100_v25 = vsel %vm1099_vm14, %v2453_v49, %v1096_v60  ;;  %v1116_v44 = vand.u32 2147483647, %v2429_v58  ;;  %v1124_v45 = vsub.f32 1.0, %v1123_v62  ;;  %vm1112_vm1 = vweird.f32 %v2429_v58 }
 0x1b7   : > { %v1110_v31 = vmul.f32 %v1631_v38, %v1109_v36  ;;  %v1105_v46 = vsel %vm1102_vm0, %v1104_v11, %v1100_v25  ;;  %v1133_v35 = vand.u32 2147483648, %v2418_v20  ;;  %vm1128_vm3 = vweird.f32 %v1633_v19  ;;  %vm1114_vm4 = vmor %vm1112_vm1, %vm1113_vm15  ;;  %v852_v22 = vpop.f32.mrf.mxu0 }
 0x1b8   : > { %1204 = vperm.xlu2 %1536, %v1105_v46   ;;  %v1125_v47 = vmul.f32 %v1633_v19, %v1124_v45  ;;  %v1131_v59 = vand.u32 2147483647, %v2418_v20  ;;  %v1119_v1 = vor.u32 1.1754944e-38, %v1118_v48  ;;  %vm1117_vm5 = vcmp.eq.f32.partialorder %v1116_v44, 8.507059e+37  ;;  %v714_v48 = vld [vmem:[%s2111_s28 + $0x50] sm:$0xff] }
 0x1b9   : > { %v1111_v13 = vadd.f32 %v1631_v38, %v1110_v31  ;;  %vm1127_vm6 = vweird.f32 %v2418_v20  ;;  %v1134_v58 = vor.u32 1.1754944e-38, %v1133_v35  ;;  %v801_v20 = vmul.f32 %v2181_v41, %v705_v34  ;;  %v706_v41 = vld [vmem:[%s2111_s28 + $0x10] sm:$0xff]  ;;  %v885_v31 = vpop.f32.mrf.mxu3 }
 0x1ba   : > { %v1126_v49 = vadd.f32 %v1633_v19, %v1125_v47  ;;  %vm1129_vm7 = vmor %vm1127_vm6, %vm1128_vm3  ;;  %vm1132_vm8 = vcmp.eq.f32.partialorder %v1131_v59, 8.507059e+37  ;;  %v804_v16 = vmul.f32 %v2185_v28, %v708_v53  ;;  %v876_v39 = vpop.f32.mrf.mxu2  ;;  %v807_v7 = vmul.f32 %v2191_v2, %v711_v6  ;;  %v715_v6 = vld [vmem:[%s2111_s28 + $0x58] sm:$0xff] }
 0x1bb   : > { %v1115_v14 = vsel %vm1114_vm4, %v1631_v38, %v1111_v13  ;;  %v853_v17 = vadd.f32 %v852_v22, %v801_v20  ;;  %v802_v10 = vmul.f32 %v2179_v40, %v706_v41  ;;  %v800_v32 = vmul.f32 %v2177_v15, %v704_v24  ;;  %v707_v40 = vld [vmem:[%s2111_s28 + $0x18] sm:$0xff] }
 0x1bc   : > { %v1120_v23 = vsel %vm1117_vm5, %v1119_v1, %v1115_v14  ;;  %v1130_v12 = vsel %vm1129_vm7, %v1633_v19, %v1126_v49  ;;  %v862_v37 = vadd.f32 %v861_v21, %v804_v16  ;;  %v810_v15 = vmul.f32 %v2197_v52, %v714_v48  ;;  %v709_v14 = vld [vmem:[%s2111_s28 + $0x28] sm:$0xff]  ;;  %v710_v49 = vld [vmem:[%s2111_s28 + $0x30] sm:$0xff] }
 0x1bd   : > { %1209 = vperm.xlu1 %1535, %v1120_v23   ;;  %v1135_v0 = vsel %vm1132_vm8, %v1134_v58, %v1130_v12  ;;  %v867_v38 = vpop.f32.mrf.mxu1  ;;  %v850_v60 = vadd.f32 %v849_v51, %v800_v32  ;;  %v803_v45 = vmul.f32 %v2183_v4, %v707_v40  ;;  %v717_v23 = vld [vmem:[%s2111_s28 + $0x68] sm:$0xff]  ;;  %v805_v52 = vmul.f32 %v2187_v29, %v709_v14  ;;  %v712_v29 = vld [vmem:[%s2111_s28 + $0x40] sm:$0xff] }
 0x1be   : > { %1214 = vperm.xlu0 %1537, %v1135_v0   ;;  %v806_v4 = vmul.f32 %v2189_v33, %v710_v49  ;;  %v813_v12 = vmul.f32 %v2203_v56, %v717_v23  ;;  %v713_v33 = vld [vmem:[%s2111_s28 + $0x48] sm:$0xff]  ;;  %v808_v56 = vmul.f32 %v2193_v18, %v712_v29  ;;  %v811_v18 = vmul.f32 %v2199_v55, %v715_v6 }
 0x1bf   : > { %v855_v28 = vpop.f32.mrf.mxu0  ;;  %v865_v0 = vadd.f32 %v864_v42, %v805_v52  ;;  %v809_v42 = vmul.f32 %v2195_v50, %v713_v33  ;;  %v716_v50 = vld [vmem:[%s2111_s28 + $0x60] sm:$0xff] }
 0x1c0   : > { %v856_v54 = vadd.f32 %v855_v28, %v802_v10  ;;  %v868_v21 = vadd.f32 %v867_v38, %v806_v4  ;;  %v874_v53 = vadd.f32 %v2497_v63, %v808_v56 }
 0x1c1   : > { %v888_v58 = vpop.f32.mrf.mxu3  ;;  %v877_v38 = vadd.f32 %v876_v39, %v809_v42  ;;  %v812_v39 = vmul.f32 %v2201_v5, %v716_v50 }
 0x1c2   : > { %v879_v25 = vpop.f32.mrf.mxu2  ;;  %v889_v51 = vadd.f32 %v888_v58, %v813_v12 }
 0x1c3   : > { %v880_v46 = vadd.f32 %v879_v25, %v810_v15  ;;  %v886_v28 = vadd.f32 %v885_v31, %v812_v39 }
 0x1c5   : > { %v870_v3 = vpop.f32.mrf.mxu1 }
 0x1c6   : > { %v871_v8 = vadd.f32 %v870_v3, %v807_v7 }
 0x1c7   : > { %v858_v44 = vpop.f32.mrf.mxu0 }
 0x1c8   : > { %v859_v13 = vadd.f32 %v858_v44, %v803_v45 }
 0x1c9   : > { %v891_v3 = vpop.f32.mrf.mxu3 }
 0x1ca   : > { %v882_v41 = vpop.f32.mrf.mxu2 }
 0x1cb   : > { %v883_v63 = vadd.f32 %v882_v41, %v811_v18 }
 0x1ee   : > { %v1145_v43 = vpop.permute.xlu2 %1144 }
 0x1ef   : > { %v1218_v27 = vmul.f32 %v1145_v43, %v853_v17 }
 0x1f1   : > { %1235 = vst.msk [vmem:[%s2111_s28 + $0x8] sm:$0xff] %vm286_vm2, %v1218_v27 }
 0x1f6   : > { %v1160_v26 = vpop.permute.xlu2 %1159 }
 0x1f7   : > { %v1221_v19 = vmul.f32 %v1160_v26, %v862_v37 }
 0x1f9   : > { %1238 = vst.msk [vmem:[%s2111_s28 + $0x20] sm:$0xff] %vm286_vm2, %v1221_v19 }
 0x200   : > { %v1175_v9 = vpop.permute.xlu2 %1174 }
 0x201   : > { %v1224_v61 = vmul.f32 %v1175_v9, %v871_v8  ;;  %v718_v8 = vld [vmem:[%s2111_s28 + $0x70] sm:$0xff]  ;;  %v719_v9 = vld [vmem:[%s2111_s28 + $0x78] sm:$0xff] }
 0x202   : > { %v1150_v36 = vpop.permute.xlu1 %1149  ;;  %v814_v55 = vmul.f32 %v2205_v30, %v718_v8 }
 0x203   : > { %1241 = vst.msk [vmem:[%s2111_s28 + $0x38] sm:$0xff] %vm286_vm2, %v1224_v61  ;;  %v1219_v62 = vmul.f32 %v1150_v36, %v856_v54  ;;  %v894_v54 = vpop.f32.mrf.mxu3  ;;  %v815_v61 = vmul.f32 %v2207_v57, %v719_v9 }
 0x204   : > { %v1140_v11 = vpop.permute.xlu0 %1139 }
 0x205   : > { %v1217_v2 = vmul.f32 %v1140_v11, %v850_v60  ;;  %1236 = vst.msk [vmem:[%s2111_s28 + $0x10] sm:$0xff] %vm286_vm2, %v1219_v62  ;;  %v892_v60 = vadd.f32 %v891_v3, %v814_v55  ;;  %v895_v36 = vadd.f32 %v894_v54, %v815_v61 }
 0x207   : > { %1234 = vst.msk [vmem:[%s2111_s28] sm:$0xff] %vm286_vm2, %v1217_v2 }
 0x208   : > { %v1190_v35 = vpop.permute.xlu2 %1189 }
 0x209   : > { %v1227_v47 = vmul.f32 %v1190_v35, %v880_v46 }
 0x20b   : > { %1244 = vst.msk [vmem:[%s2111_s28 + $0x50] sm:$0xff] %vm286_vm2, %v1227_v47 }
 0x20c   : > { %v1155_v59 = vpop.permute.xlu0 %1154 }
 0x20d   : > { %v1220_v1 = vmul.f32 %v1155_v59, %v859_v13 }
 0x20f   : > { %1237 = vst.msk [vmem:[%s2111_s28 + $0x18] sm:$0xff] %vm286_vm2, %v1220_v1 }
 0x212   : > { %v1205_v20 = vpop.permute.xlu2 %1204 }
 0x213   : > { %v1230_v27 = vmul.f32 %v1205_v20, %v889_v51 }
 0x214   : > { %v1165_v34 = vpop.permute.xlu1 %1164  ;;  %v1170_v22 = vpop.permute.xlu0 %1169 }
 0x215   : > { %v1222_v17 = vmul.f32 %v1165_v34, %v865_v0  ;;  %v1223_v43 = vmul.f32 %v1170_v22, %v868_v21  ;;  %1247 = vst.msk [vmem:[%s2111_s28 + $0x68] sm:$0xff] %vm286_vm2, %v1230_v27 }
 0x217   : > { %1239 = vst.msk [vmem:[%s2111_s28 + $0x28] sm:$0xff] %vm286_vm2, %v1222_v17 }
 0x218   : > { %1240 = vst.msk [vmem:[%s2111_s28 + $0x30] sm:$0xff] %vm286_vm2, %v1223_v43 }
 0x21d   : > { %v1180_v16 = vpop.permute.xlu1 %1179 }
 0x21e   : > { %v1225_v37 = vmul.f32 %v1180_v16, %v874_v53  ;;  %v1185_v26 = vpop.permute.xlu0 %1184 }
 0x21f   : > { %v1226_v19 = vmul.f32 %v1185_v26, %v877_v38 }
 0x220   : > { %1242 = vst.msk [vmem:[%s2111_s28 + $0x40] sm:$0xff] %vm286_vm2, %v1225_v37 }
 0x221   : > { %1243 = vst.msk [vmem:[%s2111_s28 + $0x48] sm:$0xff] %vm286_vm2, %v1226_v19 }
 0x225   : > { %v1195_v24 = vpop.permute.xlu1 %1194 }
 0x226   : > { %v1228_v7 = vmul.f32 %v1195_v24, %v883_v63 }
 0x228   : > { %1245 = vst.msk [vmem:[%s2111_s28 + $0x58] sm:$0xff] %vm286_vm2, %v1228_v7  ;;  %v1200_v10 = vpop.permute.xlu0 %1199 }
 0x229   : > { %v1229_v32 = vmul.f32 %v1200_v10, %v886_v28 }
 0x22b   : > { %1246 = vst.msk [vmem:[%s2111_s28 + $0x60] sm:$0xff] %vm286_vm2, %v1229_v32 }
 0x22f   : > { %v1210_v5 = vpop.permute.xlu1 %1209 }
 0x230   : > { %v1231_v62 = vmul.f32 %v1210_v5, %v892_v60  ;;  %v1215_v11 = vpop.permute.xlu0 %1214 }
 0x231   : > { %v1232_v48 = vmul.f32 %v1215_v11, %v895_v36 }
 0x232   : > { %1248 = vst.msk [vmem:[%s2111_s28 + $0x70] sm:$0xff] %vm286_vm2, %v1231_v62 }
 0x233   : > { %1249 = vst.msk [vmem:[%s2111_s28 + $0x78] sm:$0xff] %vm286_vm2, %v1232_v48 }
 0x234 PF: > { %s12_s13 = sadd.s32 1, %s1672_s13   ;;  %s2594_s9 = smov %s1664_s11 }
 0x235   : > { %p9_p7 = scmp.ge.s32.totalorder %s12_s13, 10   ;;  %s2595_s10 = smov %s1668_s12 }
 0x236   : > { %s2596_s11 = smov %s2599_s14  ;;  %s2597_s12 = smov %s2603_s15 }
 0x237   :  { %11 = sbr.rel (!%p9_p7) target bundleno = 3 (0x3), region = 65 }

</bundles_post_ra>
